<compile_context>
chip_gen: v7x
topology: tpu7x:2x2x1
jax: 0.10.0
libtpu: 0.0.40
codegen_flags: <defaults>
</compile_context>

<pallas_src>
import jax
import jax.numpy as jnp
from jax.experimental import pallas as pl
from jax.experimental.pallas import tpu as pltpu

T_DISTILL = 2.0  # kd_kl_loss defaults: T=2, w=1, gamma=1


def _macro_attention_kernel(aux_ref, s_ref, t_ref, out_ref,
                            acc_ts, acc_q, acc_c, acc_lz):
    j = pl.program_id(1)   # tile index inside the batch slice (sequential reduction axis)

    @pl.when(j == 0)
    def _():
        acc_ts[...] = jnp.zeros_like(acc_ts)
        acc_q[...] = jnp.zeros_like(acc_q)
        acc_c[...] = jnp.zeros_like(acc_c)
        acc_lz[...] = jnp.zeros_like(acc_lz)

    inv_t = 1.0 / T_DISTILL
    s = s_ref[...].astype(jnp.float32) * inv_t       # student logits / T   (tile_n, C)
    t = t_ref[...].astype(jnp.float32) * inv_t       # teacher logits / T   (tile_n, C)
    w_pow = aux_ref[1:2, :]                          # (1, C) = exp((logw - shift)/T)

    # teacher soft targets q = softmax(t/T).  Exact per-row reciprocal (not the approx EUP
    # one): the row-constant hoist below relies on sum_c q == 1.
    m_t = jnp.max(t, axis=-1, keepdims=True)
    e_t = jnp.exp(t - m_t)
    z_t = jnp.sum(e_t, axis=-1, keepdims=True)
    q = e_t * (1.0 / z_t)

    # student: one shared exp pass serves both the plain and the class-balanced softmax
    m_s = jnp.max(s, axis=-1, keepdims=True)
    e_s = jnp.exp(s - m_s)
    z_p = jnp.sum(e_s, axis=-1, keepdims=True)
    z_b = jnp.sum(e_s * w_pow, axis=-1, keepdims=True)
    log_zp = jnp.log(z_p)

    # per-row scalars hoisted out of the per-element KL term (sum_c q == 1):
    #   kl_row = sum_c q*(t - s) + c_row ;  balanced adds lz_row - (1/T)*sum_c q*logw + shift/T
    c_row = (m_s - m_t) + (log_zp - jnp.log(z_t))    # (tile_n, 1)
    lz = jnp.log(z_b) - log_zp                       # (tile_n, 1)

    # Row reductions offloaded to the (otherwise idle) MXU via ones(8,tile) @ X: keeps the
    # VALU free and turns the accumulator update into full unmasked (8, C) stores.
    ones = jnp.ones((8, s.shape[0]), jnp.float32)
    acc_ts[...] += jnp.dot(ones, q * (t - s), preferred_element_type=jnp.float32)
    acc_q[...] += jnp.dot(ones, q, preferred_element_type=jnp.float32)
    acc_c[...] += jnp.sum(c_row, axis=0, keepdims=True)   # per-row work, negligible
    acc_lz[...] += jnp.sum(lz, axis=0, keepdims=True)

    @pl.when(j == pl.num_programs(1) - 1)
    def _():
        logw = aux_ref[0:1, :]                                                # (1, C)
        kl_p = jnp.sum(acc_ts[0:1, :], axis=-1, keepdims=True) + acc_c[...]   # (1, 1)
        corr = (-(1.0 / T_DISTILL)
                * jnp.sum(acc_q[0:1, :] * logw, axis=-1, keepdims=True)
                + acc_lz[...])
        kl_b = kl_p + corr
        # per-slice partial sums at lanes 0 / 1 of sublane 0 of the (8, 128) output block
        lane = jax.lax.broadcasted_iota(jnp.int32, out_ref.shape, 1)
        sub = jax.lax.broadcasted_iota(jnp.int32, out_ref.shape, 0)
        vals = jnp.where(jnp.logical_and(sub == 0, lane == 0), kl_p, 0.0)
        vals = jnp.where(jnp.logical_and(sub == 0, lane == 1), kl_b, vals)
        out_ref[...] = vals


def _hw_defaults():
    """Generation-aware defaults: (streaming budget, scoped VMEM cap, tile row cap,
    default number of batch slices)."""
    vmem_bytes = 64 << 20                      # conservative fallback (v7x-class)
    try:
        vmem_bytes = int(pltpu.get_tpu_info().vmem_capacity_bytes)
    except Exception:
        pass
    two_core = False
    try:
        two_core = "7" in jax.devices()[0].device_kind.lower()   # v7x: 2 TCs per chip
    except Exception:
        pass
    if vmem_bytes <= (80 << 20):               # v7x-class: 64 MiB per TensorCore
        budget, vmem_cap, tile_cap = 28 << 20, 40 << 20, 4096
    else:                                      # v5e / v6e: 128 MiB per TensorCore
        budget, vmem_cap, tile_cap = 80 << 20, 96 << 20, 8192
    return budget, vmem_cap, tile_cap, (2 if two_core else 1)


def _pick_tile_n(n_rows, n_classes, itemsize_sum, num_slices, budget_bytes, tile_cap):
    """Largest batch tile whose double-buffered student+teacher tiles fit the streaming
    budget; big tiles amortize the ~0.35 us fixed per-grid-step pipeline overhead."""
    per_row = 2 * n_classes * itemsize_sum       # 2 pipeline buffers per streamed input
    tile = budget_bytes // max(per_row, 1)
    tile = max(16, min(tile_cap, tile))
    rows_per_slice = pl.cdiv(pl.cdiv(n_rows, num_slices), 16) * 16
    tile = min(tile, rows_per_slice)
    return max(16, (tile // 16) * 16)


def macro_attention_factor_forward(logits, teacher_logits, W, b,
                                   cls_num_list=None, gamma=1.0,
                                   tile_n=None, num_slices=None, stream_dtype=None):
    """Pallas TPU implementation of macro_attention_factor.forward (option='student')."""
    N, C = logits.shape
    assert teacher_logits.shape == (N, C)

    # TODO(synk): for C < 64 the class axis underfills the 128-lane vregs; packing several
    #             rows per vreg (wrapper-side reshape) would raise VPU/EUP utilization.
    # TODO(synk): on v6e/v7x a bf16 max-subtract/exp chain (keeping sums/logs/accumulators
    #             in f32) would roughly double VALU/EUP throughput for bf16 inputs.

    if stream_dtype is not None:
        # optional downcast (e.g. bf16) to halve HBM traffic when inputs arrive as f32
        logits = logits.astype(stream_dtype)
        teacher_logits = teacher_logits.astype(stream_dtype)

    if cls_num_list is None:
        # cls_num_list unset: kd_kl_loss applies no class shift, balanced loss == plain loss.
        logw = jnp.zeros((C,), jnp.float32)
    else:
        cls = jnp.asarray(cls_num_list, jnp.float32).reshape(C)
        logw = jnp.log(cls / jnp.sum(cls) + 1e-9) * gamma
    # stabiliser so the shared student max stays valid even if logw > 0 (e.g. gamma < 0)
    logw_shift = jnp.maximum(jnp.max(logw), 0.0)
    w_pow = jnp.exp((logw - logw_shift) / T_DISTILL)
    aux = jnp.stack([logw, w_pow], axis=0)                       # (2, C) f32

    budget, vmem_cap, tile_cap, default_slices = _hw_defaults()
    if num_slices is None:
        num_slices = default_slices            # 1 on single-TC parts (v5e/v6e), 2 on v7x
    num_slices = max(1, min(num_slices, pl.cdiv(N, 16)))

    itemsize_sum = (jnp.dtype(logits.dtype).itemsize
                    + jnp.dtype(teacher_logits.dtype).itemsize)
    if tile_n is None:
        tile_n = _pick_tile_n(N, C, itemsize_sum, num_slices, budget, tile_cap)
    tile_n = max(16, (tile_n // 16) * 16)

    tiles_total = pl.cdiv(N, tile_n)
    tiles_per_slice = pl.cdiv(tiles_total, num_slices)
    n_pad = num_slices * tiles_per_slice * tile_n
    n_pad_rows = n_pad - N
    if n_pad_rows > 0:
        # Padded rows MUST be all-zero logits: their plain-KL contribution is then exactly
        # zero and their balanced-correction contribution is closed-form (removed below),
        # so the kernel needs no per-tile masking at all.
        logits = jnp.pad(logits, ((0, n_pad_rows), (0, 0)))
        teacher_logits = jnp.pad(teacher_logits, ((0, n_pad_rows), (0, 0)))

    # double-buffered streaming working set + headroom, capped per generation
    stream_bytes = 2 * tile_n * C * itemsize_sum
    vmem_limit = int(min(vmem_cap, max(16 << 20, stream_bytes + (12 << 20))))

    partials = pl.pallas_call(
        _macro_attention_kernel,
        out_shape=jax.ShapeDtypeStruct((num_slices * 8, 128), jnp.float32),
        grid_spec=pltpu.PrefetchScalarGridSpec(
            num_scalar_prefetch=0,
            grid=(num_slices, tiles_per_slice),
            in_specs=[
                pl.BlockSpec((2, C), lambda p, j: (0, 0)),                             # logw / exp(logw/T)
                pl.BlockSpec((tile_n, C), lambda p, j: (p * tiles_per_slice + j, 0)),  # student tile
                pl.BlockSpec((tile_n, C), lambda p, j: (p * tiles_per_slice + j, 0)),  # teacher tile
            ],
            out_specs=pl.BlockSpec((8, 128), lambda p, j: (p, 0)),
            scratch_shapes=[pltpu.VMEM((8, C), jnp.float32),   # sum_rows q*(t-s)  (MXU)
                            pltpu.VMEM((8, C), jnp.float32),   # sum_rows q        (MXU)
                            pltpu.VMEM((1, 1), jnp.float32),   # sum_rows row-constant
                            pltpu.VMEM((1, 1), jnp.float32)],  # sum_rows (log Zb - log Zp)
        ),
        # TODO(synk): on v7x, confirm in the profile that the slice axis shards across both
        #             TensorCores; if one TC sits idle, switch axis 0 to pltpu.CORE_PARALLEL.
        compiler_params=pltpu.CompilerParams(
            dimension_semantics=("parallel", "arbitrary"),
            vmem_limit_bytes=vmem_limit),
    )(aux, logits, teacher_logits)

    # combine per-slice partials; KLDivLoss(reduction='mean') divides by N*C
    inv_count = 1.0 / (N * C)
    kl_p_total = jnp.sum(partials[:, 0])
    kl_b_total = jnp.sum(partials[:, 1])
    if n_pad_rows > 0:
        # analytic removal of the zero-logit padded rows from the balanced correction
        pad_corr = (-(1.0 / T_DISTILL) * (n_pad_rows / C) * jnp.sum(logw)
                    + n_pad_rows * (jnp.log(jnp.sum(w_pow)) - jnp.log(jnp.float32(C))))
        kl_b_total = kl_b_total - pad_corr
    kl_b_total = kl_b_total + N * logw_shift / T_DISTILL

    loss_p = kl_p_total * inv_count
    loss_b = kl_b_total * inv_count

    # tiny Linear(2,2) + softmax epilogue (O(1) work, kept in plain JAX)
    z = jnp.asarray(W, jnp.float32) @ jnp.stack([loss_p, loss_b]) \
        + jnp.asarray(b, jnp.float32).reshape(2)
    f = jax.nn.softmax(z)
    return f[0] * loss_p + f[1] * loss_b


def _reference_forward(logits, teacher_logits, W, b, cls_num_list, gamma=1.0):
    """Plain-JAX replica of the PyTorch module for verification."""
    s = logits.astype(jnp.float32)
    t = teacher_logits.astype(jnp.float32)

    def kd(s_, t_, logw=None):
        if logw is not None:
            s_ = s_ + logw
        log_p = jax.nn.log_softmax(s_ / T_DISTILL, axis=1)
        q = jax.nn.softmax(t_ / T_DISTILL, axis=1)
        return jnp.mean(q * (jnp.log(q) - log_p))

    loss = kd(s, t)
    if cls_num_list is None:
        bal = loss
    else:
        cls = jnp.asarray(cls_num_list, jnp.float32).reshape(1, -1)
        logw = jnp.log(cls / jnp.sum(cls) + 1e-9) * gamma
        bal = kd(s, t, logw)
    z = jnp.asarray(W, jnp.float32) @ jnp.stack([loss, bal]) + jnp.asarray(b, jnp.float32)
    f = jax.nn.softmax(z)
    return f[0] * loss + f[1] * bal


if __name__ == "__main__":
    key = jax.random.PRNGKey(0)
    k1, k2, k3, k4 = jax.random.split(key, 4)

    # nn.Linear(2, 2) parameters, deterministic synthetic init
    W = jax.random.uniform(k3, (2, 2), jnp.float32, minval=-0.7, maxval=0.7)
    b = jax.random.uniform(k4, (2,), jnp.float32, minval=-0.7, maxval=0.7)

    # case 1: lane-dense class axis, f32 inputs, hardware-default tiling/slicing
    N, C = 256, 128
    logits = jax.random.normal(k1, (N, C), jnp.float32)
    teacher = jax.random.normal(k2, (N, C), jnp.float32)
    cls_num_list = [float(1000 - 7 * i) for i in range(C)]   # long-tailed class counts

    total = jax.block_until_ready(
        macro_attention_factor_forward(logits, teacher, W, b, cls_num_list=cls_num_list))
    ref = _reference_forward(logits, teacher, W, b, cls_num_list)
    assert jnp.allclose(total, ref, rtol=5e-3, atol=1e-5), (total, ref)

    # case 2: multi-tile sequential accumulation on a single slice (forced small tile)
    total_acc = jax.block_until_ready(
        macro_attention_factor_forward(logits, teacher, W, b, cls_num_list=cls_num_list,
                                       tile_n=64, num_slices=1))
    assert jnp.allclose(total_acc, ref, rtol=5e-3, atol=1e-5), (total_acc, ref)

    # case 3: ragged batch (zero-padded rows removed analytically), small class count,
    #         forced two batch slices
    N2, C2 = 100, 40
    l2 = jax.random.normal(jax.random.PRNGKey(1), (N2, C2), jnp.float32)
    t2 = jax.random.normal(jax.random.PRNGKey(2), (N2, C2), jnp.float32)
    cls2 = [float(200 - 3 * i) for i in range(C2)]
    total2 = jax.block_until_ready(
        macro_attention_factor_forward(l2, t2, W, b, cls_num_list=cls2, num_slices=2))
    ref2 = _reference_forward(l2, t2, W, b, cls2)
    assert jnp.allclose(total2, ref2, rtol=5e-3, atol=1e-5), (total2, ref2)

    # case 4: native bf16 streaming inputs (no wrapper upcast, kernel casts in VMEM)
    total3 = jax.block_until_ready(
        macro_attention_factor_forward(logits.astype(jnp.bfloat16),
                                       teacher.astype(jnp.bfloat16),
                                       W, b, cls_num_list=cls_num_list))
    ref3 = _reference_forward(logits.astype(jnp.bfloat16), teacher.astype(jnp.bfloat16),
                              W, b, cls_num_list)
    assert jnp.allclose(total3, ref3, rtol=2e-2, atol=1e-4), (total3, ref3)

    print("KERNEL_OK")
</pallas_src>

<mosaic_0001>
module attributes {stable_mosaic.version = 11 : i64} {
  func.func @_macro_attention_kernel(%arg0: i32, %arg1: i32, %arg2: memref<2x128xf32, #tpu.memory_space<vmem>>, %arg3: memref<256x128xf32, #tpu.memory_space<vmem>>, %arg4: memref<256x128xf32, #tpu.memory_space<vmem>>, %arg5: memref<8x128xf32, #tpu.memory_space<vmem>>, %arg6: memref<8x128xf32, #tpu.memory_space<vmem>>, %arg7: memref<8x128xf32, #tpu.memory_space<vmem>>, %arg8: memref<1x1xf32, #tpu.memory_space<vmem>>, %arg9: memref<1x1xf32, #tpu.memory_space<vmem>>) attributes {dimension_semantics = [#tpu.dimension_semantics<parallel>, #tpu.dimension_semantics<arbitrary>], iteration_bounds = array<i64: 1, 1>, scalar_prefetch = 0 : i64, scratch_operands = 4 : i64, tpu.core_type = #tpu.core_type<tc>, window_params = [{pipeline_mode = #tpu.pipeline_mode<synchronous>, transform_indices = @transform_0, window_bounds = array<i64: 2, 128>}, {transform_indices = @transform_1, window_bounds = array<i64: 256, 128>}, {transform_indices = @transform_2, window_bounds = array<i64: 256, 128>}, {transform_indices = @transform_3, window_bounds = array<i64: 8, 128>}]} {
    %c0_i32 = arith.constant 0 : i32
    %0 = arith.cmpi eq, %arg1, %c0_i32 : i32
    %1 = arith.extui %0 : i1 to i32
    %c0_i32_0 = arith.constant 0 : i32
    %2 = arith.cmpi ne, %1, %c0_i32_0 : i32
    scf.if %2 {
      %cst_35 = arith.constant 0.000000e+00 : f32
      %63 = vector.broadcast %cst_35 : f32 to vector<8x128xf32>
      %c0_36 = arith.constant 0 : index
      %c0_37 = arith.constant 0 : index
      %64 = vector.load %arg6[%c0_36, %c0_37] : memref<8x128xf32, #tpu.memory_space<vmem>>, vector<8x128xf32>
      tpu.vector_store %arg6[%c0_36, %c0_37], %63 {strides = array<i32>} : memref<8x128xf32, #tpu.memory_space<vmem>>, vector<8x128xf32>,
      %cst_38 = arith.constant 0.000000e+00 : f32
      %65 = vector.broadcast %cst_38 : f32 to vector<8x128xf32>
      %c0_39 = arith.constant 0 : index
      %c0_40 = arith.constant 0 : index
      %66 = vector.load %arg7[%c0_39, %c0_40] : memref<8x128xf32, #tpu.memory_space<vmem>>, vector<8x128xf32>
      tpu.vector_store %arg7[%c0_39, %c0_40], %65 {strides = array<i32>} : memref<8x128xf32, #tpu.memory_space<vmem>>, vector<8x128xf32>,
      %cst_41 = arith.constant 0.000000e+00 : f32
      %67 = vector.broadcast %cst_41 : f32 to vector<1x1xf32>
      %c0_42 = arith.constant 0 : index
      %c0_43 = arith.constant 0 : index
      %68 = vector.load %arg8[%c0_42, %c0_43] : memref<1x1xf32, #tpu.memory_space<vmem>>, vector<1x1xf32>
      tpu.vector_store %arg8[%c0_42, %c0_43], %67 {strides = array<i32>} : memref<1x1xf32, #tpu.memory_space<vmem>>, vector<1x1xf32>,
      %cst_44 = arith.constant 0.000000e+00 : f32
      %69 = vector.broadcast %cst_44 : f32 to vector<1x1xf32>
      %c0_45 = arith.constant 0 : index
      %c0_46 = arith.constant 0 : index
      %70 = vector.load %arg9[%c0_45, %c0_46] : memref<1x1xf32, #tpu.memory_space<vmem>>, vector<1x1xf32>
      tpu.vector_store %arg9[%c0_45, %c0_46], %69 {strides = array<i32>} : memref<1x1xf32, #tpu.memory_space<vmem>>, vector<1x1xf32>,
    } else {
    }
    %c0 = arith.constant 0 : index
    %c0_1 = arith.constant 0 : index
    %3 = vector.load %arg3[%c0, %c0_1] : memref<256x128xf32, #tpu.memory_space<vmem>>, vector<256x128xf32>
    %cst = arith.constant 5.000000e-01 : f32
    %4 = vector.broadcast %cst : f32 to vector<256x128xf32>
    %5 = arith.mulf %3, %4 : vector<256x128xf32>
    %c0_2 = arith.constant 0 : index
    %c0_3 = arith.constant 0 : index
    %6 = vector.load %arg4[%c0_2, %c0_3] : memref<256x128xf32, #tpu.memory_space<vmem>>, vector<256x128xf32>
    %cst_4 = arith.constant 5.000000e-01 : f32
    %7 = vector.broadcast %cst_4 : f32 to vector<256x128xf32>
    %8 = arith.mulf %6, %7 : vector<256x128xf32>
    %c1 = arith.constant 1 : index
    %c0_5 = arith.constant 0 : index
    %9 = vector.load %arg2[%c1, %c0_5] : memref<2x128xf32, #tpu.memory_space<vmem>>, vector<1x128xf32>
    %cst_6 = arith.constant dense<0xFF800000> : vector<256xf32>
    %10 = vector.multi_reduction <maximumf>, %8, %cst_6 [1] : vector<256x128xf32> to vector<256xf32>
    %11 = vector.shape_cast %10 : vector<256xf32> to vector<256x1xf32>
    %12 = vector.broadcast %11 : vector<256x1xf32> to vector<256x128xf32>
    %13 = arith.subf %8, %12 : vector<256x128xf32>
    %14 = math.exp %13 : vector<256x128xf32>
    %cst_7 = arith.constant dense<0.000000e+00> : vector<256xf32>
    %15 = vector.multi_reduction <add>, %14, %cst_7 [1] : vector<256x128xf32> to vector<256xf32>
    %16 = vector.shape_cast %15 : vector<256xf32> to vector<256x1xf32>
    %cst_8 = arith.constant 1.000000e+00 : f32
    %17 = vector.broadcast %cst_8 : f32 to vector<256x1xf32>
    %18 = arith.divf %17, %16 : vector<256x1xf32>
    %19 = vector.broadcast %18 : vector<256x1xf32> to vector<256x128xf32>
    %20 = arith.mulf %14, %19 : vector<256x128xf32>
    %cst_9 = arith.constant dense<0xFF800000> : vector<256xf32>
    %21 = vector.multi_reduction <maximumf>, %5, %cst_9 [1] : vector<256x128xf32> to vector<256xf32>
    %22 = vector.shape_cast %21 : vector<256xf32> to vector<256x1xf32>
    %23 = vector.broadcast %22 : vector<256x1xf32> to vector<256x128xf32>
    %24 = arith.subf %5, %23 : vector<256x128xf32>
    %25 = math.exp %24 : vector<256x128xf32>
    %cst_10 = arith.constant dense<0.000000e+00> : vector<256xf32>
    %26 = vector.multi_reduction <add>, %25, %cst_10 [1] : vector<256x128xf32> to vector<256xf32>
    %27 = vector.shape_cast %26 : vector<256xf32> to vector<256x1xf32>
    %28 = vector.broadcast %9 : vector<1x128xf32> to vector<256x128xf32>
    %29 = arith.mulf %25, %28 : vector<256x128xf32>
    %cst_11 = arith.constant dense<0.000000e+00> : vector<256xf32>
    %30 = vector.multi_reduction <add>, %29, %cst_11 [1] : vector<256x128xf32> to vector<256xf32>
    %31 = vector.shape_cast %30 : vector<256xf32> to vector<256x1xf32>
    %32 = math.log %27 : vector<256x1xf32>
    %33 = arith.subf %22, %11 : vector<256x1xf32>
    %34 = math.log %16 : vector<256x1xf32>
    %35 = arith.subf %32, %34 : vector<256x1xf32>
    %36 = arith.addf %33, %35 : vector<256x1xf32>
    %37 = math.log %31 : vector<256x1xf32>
    %38 = arith.subf %37, %32 : vector<256x1xf32>
    %cst_12 = arith.constant 1.000000e+00 : f32
    %39 = vector.broadcast %cst_12 : f32 to vector<8x256xf32>
    %c0_13 = arith.constant 0 : index
    %c0_14 = arith.constant 0 : index
    %40 = vector.load %arg6[%c0_13, %c0_14] : memref<8x128xf32, #tpu.memory_space<vmem>>, vector<8x128xf32>
    %41 = arith.subf %8, %5 : vector<256x128xf32>
    %42 = arith.mulf %20, %41 : vector<256x128xf32>
    %cst_15 = arith.constant dense<0.000000e+00> : vector<8x128xf32>
    %43 = tpu.matmul %39, %42, %cst_15 {dimension_numbers = #tpu.dot_dimension_numbers<[1], [0], [0], [1], [0, 0, 1, 1], [], []>} : vector<8x256xf32>, vector<256x128xf32>, vector<8x128xf32> -> vector<8x128xf32>
    %44 = arith.addf %40, %43 : vector<8x128xf32>
    %c0_16 = arith.constant 0 : index
    %c0_17 = arith.constant 0 : index
    %45 = vector.load %arg6[%c0_16, %c0_17] : memref<8x128xf32, #tpu.memory_space<vmem>>, vector<8x128xf32>
    tpu.vector_store %arg6[%c0_16, %c0_17], %44 {strides = array<i32>} : memref<8x128xf32, #tpu.memory_space<vmem>>, vector<8x128xf32>,
    %c0_18 = arith.constant 0 : index
    %c0_19 = arith.constant 0 : index
    %46 = vector.load %arg7[%c0_18, %c0_19] : memref<8x128xf32, #tpu.memory_space<vmem>>, vector<8x128xf32>
    %cst_20 = arith.constant dense<0.000000e+00> : vector<8x128xf32>
    %47 = tpu.matmul %39, %20, %cst_20 {dimension_numbers = #tpu.dot_dimension_numbers<[1], [0], [0], [1], [0, 0, 1, 1], [], []>} : vector<8x256xf32>, vector<256x128xf32>, vector<8x128xf32> -> vector<8x128xf32>
    %48 = arith.addf %46, %47 : vector<8x128xf32>
    %c0_21 = arith.constant 0 : index
    %c0_22 = arith.constant 0 : index
    %49 = vector.load %arg7[%c0_21, %c0_22] : memref<8x128xf32, #tpu.memory_space<vmem>>, vector<8x128xf32>
    tpu.vector_store %arg7[%c0_21, %c0_22], %48 {strides = array<i32>} : memref<8x128xf32, #tpu.memory_space<vmem>>, vector<8x128xf32>,
    %c0_23 = arith.constant 0 : index
    %c0_24 = arith.constant 0 : index
    %50 = vector.load %arg8[%c0_23, %c0_24] : memref<1x1xf32, #tpu.memory_space<vmem>>, vector<1x1xf32>
    %cst_25 = arith.constant dense<0.000000e+00> : vector<1xf32>
    %51 = vector.multi_reduction <add>, %36, %cst_25 [0] : vector<256x1xf32> to vector<1xf32>
    %52 = vector.shape_cast %51 : vector<1xf32> to vector<1x1xf32>
    %53 = arith.addf %50, %52 : vector<1x1xf32>
    %c0_26 = arith.constant 0 : index
    %c0_27 = arith.constant 0 : index
    %54 = vector.load %arg8[%c0_26, %c0_27] : memref<1x1xf32, #tpu.memory_space<vmem>>, vector<1x1xf32>
    tpu.vector_store %arg8[%c0_26, %c0_27], %53 {strides = array<i32>} : memref<1x1xf32, #tpu.memory_space<vmem>>, vector<1x1xf32>,
    %c0_28 = arith.constant 0 : index
    %c0_29 = arith.constant 0 : index
    %55 = vector.load %arg9[%c0_28, %c0_29] : memref<1x1xf32, #tpu.memory_space<vmem>>, vector<1x1xf32>
    %cst_30 = arith.constant dense<0.000000e+00> : vector<1xf32>
    %56 = vector.multi_reduction <add>, %38, %cst_30 [0] : vector<256x1xf32> to vector<1xf32>
    %57 = vector.shape_cast %56 : vector<1xf32> to vector<1x1xf32>
    %58 = arith.addf %55, %57 : vector<1x1xf32>
    %c0_31 = arith.constant 0 : index
    %c0_32 = arith.constant 0 : index
    %59 = vector.load %arg9[%c0_31, %c0_32] : memref<1x1xf32, #tpu.memory_space<vmem>>, vector<1x1xf32>
    tpu.vector_store %arg9[%c0_31, %c0_32], %58 {strides = array<i32>} : memref<1x1xf32, #tpu.memory_space<vmem>>, vector<1x1xf32>,
    %c0_i32_33 = arith.constant 0 : i32
    %60 = arith.cmpi eq, %arg1, %c0_i32_33 : i32
    %61 = arith.extui %60 : i1 to i32
    %c0_i32_34 = arith.constant 0 : i32
    %62 = arith.cmpi ne, %61, %c0_i32_34 : i32
    scf.if %62 {
      %c0_35 = arith.constant 0 : index
      %c0_36 = arith.constant 0 : index
      %63 = vector.load %arg2[%c0_35, %c0_36] : memref<2x128xf32, #tpu.memory_space<vmem>>, vector<1x128xf32>
      %c0_37 = arith.constant 0 : index
      %c0_38 = arith.constant 0 : index
      %64 = vector.load %arg6[%c0_37, %c0_38] : memref<8x128xf32, #tpu.memory_space<vmem>>, vector<1x128xf32>
      %cst_39 = arith.constant dense<0.000000e+00> : vector<1xf32>
      %65 = vector.multi_reduction <add>, %64, %cst_39 [1] : vector<1x128xf32> to vector<1xf32>
      %66 = vector.shape_cast %65 : vector<1xf32> to vector<1x1xf32>
      %c0_40 = arith.constant 0 : index
      %c0_41 = arith.constant 0 : index
      %67 = vector.load %arg8[%c0_40, %c0_41] : memref<1x1xf32, #tpu.memory_space<vmem>>, vector<1x1xf32>
      %68 = arith.addf %66, %67 : vector<1x1xf32>
      %c0_42 = arith.constant 0 : index
      %c0_43 = arith.constant 0 : index
      %69 = vector.load %arg7[%c0_42, %c0_43] : memref<8x128xf32, #tpu.memory_space<vmem>>, vector<1x128xf32>
      %70 = arith.mulf %69, %63 : vector<1x128xf32>
      %cst_44 = arith.constant dense<0.000000e+00> : vector<1xf32>
      %71 = vector.multi_reduction <add>, %70, %cst_44 [1] : vector<1x128xf32> to vector<1xf32>
      %72 = vector.shape_cast %71 : vector<1xf32> to vector<1x1xf32>
      %cst_45 = arith.constant -5.000000e-01 : f32
      %73 = vector.broadcast %cst_45 : f32 to vector<1x1xf32>
      %74 = arith.mulf %73, %72 : vector<1x1xf32>
      %c0_46 = arith.constant 0 : index
      %c0_47 = arith.constant 0 : index
      %75 = vector.load %arg9[%c0_46, %c0_47] : memref<1x1xf32, #tpu.memory_space<vmem>>, vector<1x1xf32>
      %76 = arith.addf %74, %75 : vector<1x1xf32>
      %77 = arith.addf %68, %76 : vector<1x1xf32>
      %78 = tpu.iota {dimensions = array<i32: 1>} : vector<8x128xi32>
      %79 = tpu.iota {dimensions = array<i32: 0>} : vector<8x128xi32>
      %c0_i32_48 = arith.constant 0 : i32
      %80 = vector.broadcast %c0_i32_48 : i32 to vector<8x128xi32>
      %81 = arith.cmpi eq, %79, %80 : vector<8x128xi32>
      %c0_i32_49 = arith.constant 0 : i32
      %82 = vector.broadcast %c0_i32_49 : i32 to vector<8x128xi32>
      %83 = arith.cmpi eq, %78, %82 : vector<8x128xi32>
      %84 = arith.andi %81, %83 : vector<8x128xi1>
      %cst_50 = arith.constant 0.000000e+00 : f32
      %85 = vector.shape_cast %68 : vector<1x1xf32> to vector<1x1xf32>
      %86 = vector.broadcast %85 : vector<1x1xf32> to vector<8x128xf32>
      %87 = vector.broadcast %cst_50 : f32 to vector<8x128xf32>
      %88 = arith.select %84, %86, %87 : vector<8x128xi1>, vector<8x128xf32>
      %c0_i32_51 = arith.constant 0 : i32
      %89 = vector.broadcast %c0_i32_51 : i32 to vector<8x128xi32>
      %90 = arith.cmpi eq, %79, %89 : vector<8x128xi32>
      %c1_i32 = arith.constant 1 : i32
      %91 = vector.broadcast %c1_i32 : i32 to vector<8x128xi32>
      %92 = arith.cmpi eq, %78, %91 : vector<8x128xi32>
      %93 = arith.andi %90, %92 : vector<8x128xi1>
      %94 = vector.shape_cast %77 : vector<1x1xf32> to vector<1x1xf32>
      %95 = vector.broadcast %94 : vector<1x1xf32> to vector<8x128xf32>
      %96 = arith.select %93, %95, %88 : vector<8x128xi1>, vector<8x128xf32>
      %c0_52 = arith.constant 0 : index
      %c0_53 = arith.constant 0 : index
      %97 = vector.load %arg5[%c0_52, %c0_53] : memref<8x128xf32, #tpu.memory_space<vmem>>, vector<8x128xf32>
      tpu.vector_store %arg5[%c0_52, %c0_53], %96 {strides = array<i32>} : memref<8x128xf32, #tpu.memory_space<vmem>>, vector<8x128xf32>,
    } else {
    }
    return
  }
  func.func @transform_0(%arg0: i32, %arg1: i32) -> (i32, i32) {
    %c0_i32 = arith.constant 0 : i32
    %c0_i32_0 = arith.constant 0 : i32
    %c0_i32_1 = arith.constant 0 : i32
    return %c0_i32, %c0_i32_0 : i32, i32
  }
  func.func @transform_1(%arg0: i32, %arg1: i32) -> (i32, i32) {
    %c1_i32 = arith.constant 1 : i32
    %0 = arith.muli %arg0, %c1_i32 : i32
    %1 = arith.addi %0, %arg1 : i32
    %c0_i32 = arith.constant 0 : i32
    %c0_i32_0 = arith.constant 0 : i32
    return %1, %c0_i32 : i32, i32
  }
  func.func @transform_2(%arg0: i32, %arg1: i32) -> (i32, i32) {
    %c1_i32 = arith.constant 1 : i32
    %0 = arith.muli %arg0, %c1_i32 : i32
    %1 = arith.addi %0, %arg1 : i32
    %c0_i32 = arith.constant 0 : i32
    %c0_i32_0 = arith.constant 0 : i32
    return %1, %c0_i32 : i32, i32
  }
  func.func @transform_3(%arg0: i32, %arg1: i32) -> (i32, i32) {
    %c0_i32 = arith.constant 0 : i32
    %c0_i32_0 = arith.constant 0 : i32
    return %arg0, %c0_i32 : i32, i32
  }
}

</mosaic_0001>

<bundles_post_ra>
// kernel: tpu_custom_call.1
= control target key start
LH: loop header
LB: loop body
LE: loop exit
PB: predicated region body
PF: predicated region fallthrough
CT: control target
= control target key end

     0   :  { %8 = vsyncpa [#allocation7], 0  ;;  %s3098_s0 = inlined_call_operand.hbm [shape: f32[2,128], index: 0, kind: input, shape index: {}]   ;;  %s3099_s1 = inlined_call_operand.hbm [shape: f32[256,128], index: 1, kind: input, shape index: {}]   ;;  %s3100_s2 = inlined_call_operand.hbm [shape: f32[256,128], index: 2, kind: input, shape index: {}]   ;;  %s3101_s3 = inlined_call_operand.hbm [shape: f32[8,128], index: 3, kind: output, shape index: {}]  }
   0x1   :  { %9 = vsyncpa [#allocation10], 0 }
   0x2   :  { %10 = vsyncpa [#allocation8], 0  ;;  %s2140_s12 = smov [#allocation9]   ;;  %s2046_s16 = scalar_lea.hbm %s3099_s1, 4096 }
   0x3   :  { %s30_s13 = sshll.u32 %s2140_s12, 4  ;;  %p2047_p0 = scmp.ne.s32.totalorder %s3099_s1, %s2046_s16  ;;  %s31_s13 = int_to_ptr.vmem [resolvable:$true] %s30_s13 }
   0x4   :  { %p2050_p1 = scmp.lt.u32.totalorder %s2046_s16, %s3099_s1 }
   0x6   :  { %p2052_p2 = pnand %p2050_p1, %p2047_p0 }
   0x8   :  { %2055 = shalt.err (!%p2052_p2)
}
   0x9   :  { %s2056_s21 = scalar_lea.vmem %s31_s13, 4096  ;;  %p2061_p4 = scmp.lt.s32.totalorder %s31_s13, %s31_s13 }
   0xa   :  { %p2057_p3 = scmp.ne.s32.totalorder %s31_s13, %s2056_s21  ;;  %p2062_p5 = scmp.lt.s32.totalorder %s2056_s21, %s2056_s21 }
   0xc   :  { %p2063_p6 = por %p2062_p5, %p2061_p4 }
   0xe   :  { %p2064_p7 = pnand %p2063_p6, %p2057_p3 }
  0x10   :  { %2067 = shalt.err (!%p2064_p7)
}
  0x11   :  { %s2141_s22 = smov 128   ;;  %s2142_s23 = smov 8  }
  0x12   :  { %36 = dma.hbm_to_vmem [thread:$0]  %s3099_s1, 4096, %s31_s13, [#allocation10], %s2141_s22, %s2141_s22, %s2142_s23  }
  0x13   :  { %s2143_s26 = smov [#allocation6]   ;;  %s2144_s28 = smov [#allocation11]  }
  0x14   :  { %s17_s27 = sshll.u32 %s2143_s26, 4  ;;  %s46_s29 = sshll.u32 %s2144_s28, 4  ;;  %s18_s27 = int_to_ptr.vmem [resolvable:$true] %s17_s27  ;;  %s47_s29 = int_to_ptr.vmem [resolvable:$true] %s46_s29 }
  0x15   :  { %s2068_s5 = scalar_lea.hbm %s3098_s0, 32 }
  0x16   :  { %p2069_p8 = scmp.ne.s32.totalorder %s3098_s0, %s2068_s5  ;;  %p2072_p9 = scmp.lt.u32.totalorder %s2068_s5, %s3098_s0 }
  0x18   :  { %p2074_p10 = pnand %p2072_p9, %p2069_p8 }
  0x1a   :  { %2077 = shalt.err (!%p2074_p10)
}
  0x1b   :  { %s2078_s1 = scalar_lea.vmem %s18_s27, 32  ;;  %p2083_p12 = scmp.lt.s32.totalorder %s18_s27, %s18_s27 }
  0x1c   :  { %p2079_p11 = scmp.ne.s32.totalorder %s18_s27, %s2078_s1  ;;  %p2084_p13 = scmp.lt.s32.totalorder %s2078_s1, %s2078_s1 }
  0x1e   :  { %p2085_p0 = por %p2084_p13, %p2083_p12 }
  0x20   :  { %p2086_p1 = pnand %p2085_p0, %p2079_p11 }
  0x22   :  { %2089 = shalt.err (!%p2086_p1)
}
  0x23   :  { %20 = dma.hbm_to_vmem [thread:$0]  %s3098_s0, 32, %s18_s27, [#allocation7]  }
  0x24   :  { %s2090_s14 = scalar_lea.hbm %s3100_s2, 4096 }
  0x25   :  { %p2091_p2 = scmp.ne.s32.totalorder %s3100_s2, %s2090_s14  ;;  %p2094_p3 = scmp.lt.u32.totalorder %s2090_s14, %s3100_s2 }
  0x27   :  { %p2096_p4 = pnand %p2094_p3, %p2091_p2 }
  0x29   :  { %2099 = shalt.err (!%p2096_p4)
}
  0x2a   :  { %s2100_s19 = scalar_lea.vmem %s47_s29, 4096  ;;  %p2105_p6 = scmp.lt.s32.totalorder %s47_s29, %s47_s29 }
  0x2b   :  { %p2101_p5 = scmp.ne.s32.totalorder %s47_s29, %s2100_s19  ;;  %p2106_p7 = scmp.lt.s32.totalorder %s2100_s19, %s2100_s19 }
  0x2d   :  { %p2107_p8 = por %p2106_p7, %p2105_p6 }
  0x2f   :  { %p2108_p9 = pnand %p2107_p8, %p2101_p5 }
  0x31   :  { %2111 = shalt.err (!%p2108_p9)
}
  0x32   :  { %52 = dma.hbm_to_vmem [thread:$0]  %s3100_s2, 4096, %s47_s29, [#allocation10], %s2141_s22, %s2141_s22, %s2142_s23  }
  0x33   :  { %2134 = dma.done.wait [#allocation7], 32  }
  0x34   :  { %2135 = vsyncadd [#allocation7], 4294967264 }
  0x35   :  { %2136 = dma.done.wait [#allocation10], 8192  }
  0x36   :  { %2137 = vsyncadd [#allocation10], 4294959104  ;;  %v155_v0 = vld [vmem:[#allocation11 + $0x80] sm:$0xff]  ;;  %v156_v1 = vld [vmem:[#allocation11 + $0x88] sm:$0xff]  ;;  %vm72_vm0 = vcmask 0   ;;  %vm1464_vm1 = vcmask 1040384  }
  0x37   :  { %v139_v2 = vld [vmem:[#allocation11] sm:$0xff]  ;;  %v2210_v3 = vmul.f32 0.5, %v155_v0  ;;  %v140_v5 = vld [vmem:[#allocation11 + $0x8] sm:$0xff]  ;;  %v2215_v6 = vmul.f32 0.5, %v156_v1  ;;  %v157_v8 = vld [vmem:[#allocation11 + $0x90] sm:$0xff]  ;;  %s2147_s21 = smov [#allocation12]  }
  0x38   :  { %v2212_v4 = vmul.f32 0.5, %v139_v2  ;;  %v2218_v7 = vmul.f32 0.5, %v140_v5  ;;  %v158_v9 = vld [vmem:[#allocation11 + $0x98] sm:$0xff]  ;;  %v2221_v10 = vmul.f32 0.5, %v157_v8  ;;  %v141_v12 = vld [vmem:[#allocation11 + $0x10] sm:$0xff]  ;;  %v159_v16 = vld [vmem:[#allocation11 + $0xa0] sm:$0xff] }
  0x39   :  { %236 = vmax.xlane.f32.xlu0 %v2210_v3  ;;  %v2224_v11 = vmul.f32 0.5, %v158_v9  ;;  %v142_v13 = vld [vmem:[#allocation11 + $0x18] sm:$0xff]  ;;  %v2227_v14 = vmul.f32 0.5, %v141_v12  ;;  %v160_v17 = vld [vmem:[#allocation11 + $0xa8] sm:$0xff]  ;;  %v2233_v18 = vmul.f32 0.5, %v159_v16  ;;  %v143_v20 = vld [vmem:[#allocation11 + $0x20] sm:$0xff] }
  0x3a   :  { %204 = vmax.xlane.f32.xlu1 %v2212_v4  ;;  %v2230_v15 = vmul.f32 0.5, %v142_v13  ;;  %v2236_v19 = vmul.f32 0.5, %v160_v17  ;;  %v144_v21 = vld [vmem:[#allocation11 + $0x28] sm:$0xff]  ;;  %v2239_v22 = vmul.f32 0.5, %v143_v20  ;;  %v161_v24 = vld [vmem:[#allocation11 + $0xb0] sm:$0xff]  ;;  %v162_v25 = vld [vmem:[#allocation11 + $0xb8] sm:$0xff] }
  0x3b   :  { %v2242_v23 = vmul.f32 0.5, %v144_v21  ;;  %v2245_v26 = vmul.f32 0.5, %v161_v24  ;;  %v2248_v27 = vmul.f32 0.5, %v162_v25  ;;  %v145_v28 = vld [vmem:[#allocation11 + $0x30] sm:$0xff]  ;;  %v146_v29 = vld [vmem:[#allocation11 + $0x38] sm:$0xff]  ;;  %v163_v32 = vld [vmem:[#allocation11 + $0xc0] sm:$0xff] }
  0x3c   :  { %v2251_v30 = vmul.f32 0.5, %v145_v28  ;;  %v2254_v31 = vmul.f32 0.5, %v146_v29  ;;  %v164_v33 = vld [vmem:[#allocation11 + $0xc8] sm:$0xff]  ;;  %v2257_v34 = vmul.f32 0.5, %v163_v32  ;;  %v147_v36 = vld [vmem:[#allocation11 + $0x40] sm:$0xff]  ;;  %v165_v40 = vld [vmem:[#allocation11 + $0xd0] sm:$0xff] }
  0x3d   :  { %238 = vmax.xlane.f32.xlu0 %v2215_v6  ;;  %v2260_v35 = vmul.f32 0.5, %v164_v33  ;;  %v148_v37 = vld [vmem:[#allocation11 + $0x48] sm:$0xff]  ;;  %v2263_v38 = vmul.f32 0.5, %v147_v36  ;;  %v166_v41 = vld [vmem:[#allocation11 + $0xd8] sm:$0xff]  ;;  %v2269_v42 = vmul.f32 0.5, %v165_v40  ;;  %v149_v44 = vld [vmem:[#allocation11 + $0x50] sm:$0xff] }
  0x3e   :  { %206 = vmax.xlane.f32.xlu1 %v2218_v7  ;;  %v2266_v39 = vmul.f32 0.5, %v148_v37  ;;  %v2272_v43 = vmul.f32 0.5, %v166_v41  ;;  %v150_v45 = vld [vmem:[#allocation11 + $0x58] sm:$0xff]  ;;  %v2275_v46 = vmul.f32 0.5, %v149_v44  ;;  %v167_v48 = vld [vmem:[#allocation11 + $0xe0] sm:$0xff]  ;;  %v168_v49 = vld [vmem:[#allocation11 + $0xe8] sm:$0xff] }
  0x3f   :  { %3219 = vst [vmem:[#allocation16_spill] sm:$0xff] %v2263_v38  ;;  %3221 = vst [vmem:[#allocation18_spill] sm:$0xff] %v2269_v42  ;;  %v2278_v47 = vmul.f32 0.5, %v150_v45  ;;  %v2281_v50 = vmul.f32 0.5, %v167_v48  ;;  %v2284_v51 = vmul.f32 0.5, %v168_v49  ;;  %v151_v52 = vld [vmem:[#allocation11 + $0x60] sm:$0xff] }
  0x40   :  { %3220 = vst [vmem:[#allocation17_spill] sm:$0xff] %v2266_v39  ;;  %3222 = vst [vmem:[#allocation19_spill] sm:$0xff] %v2272_v43  ;;  %v152_v53 = vld [vmem:[#allocation11 + $0x68] sm:$0xff]  ;;  %v2287_v54 = vmul.f32 0.5, %v151_v52  ;;  %v169_v56 = vld [vmem:[#allocation11 + $0xf0] sm:$0xff]  ;;  %s1505_s22 = sshll.u32 %s2147_s21, 4  ;;  %s1506_s22 = int_to_ptr.vmem [resolvable:$true] %s1505_s22 }
  0x41   :  { %240 = vmax.xlane.f32.xlu0 %v2221_v10  ;;  %3223 = vst [vmem:[#allocation20_spill] sm:$0xff] %v2275_v46  ;;  %3224 = vst [vmem:[#allocation21_spill] sm:$0xff] %v2278_v47  ;;  %v2290_v55 = vmul.f32 0.5, %v152_v53  ;;  %v170_v57 = vld [vmem:[#allocation11 + $0xf8] sm:$0xff]  ;;  %v2293_v58 = vmul.f32 0.5, %v169_v56  ;;  %v153_v60 = vld [vmem:[#allocation11 + $0x70] sm:$0xff]  ;;  %p2117_p11 = scmp.lt.s32.totalorder %s1506_s22, %s1506_s22 }
  0x42   :  { %242 = vmax.xlane.f32.xlu1 %v2224_v11  ;;  %3225 = vst [vmem:[#allocation22_spill] sm:$0xff] %v2281_v50  ;;  %3226 = vst [vmem:[#allocation23_spill] sm:$0xff] %v2284_v51  ;;  %v2296_v59 = vmul.f32 0.5, %v170_v57  ;;  %v154_v61 = vld [vmem:[#allocation11 + $0x78] sm:$0xff]  ;;  %v2299_v62 = vmul.f32 0.5, %v153_v60  ;;  %s2112_s24 = scalar_lea.vmem %s1506_s22, 128 }
  0x43   :  { %3227 = vst [vmem:[#allocation24_spill] sm:$0xff] %v2287_v54  ;;  %3228 = vst [vmem:[#allocation25_spill] sm:$0xff] %v2290_v55  ;;  %v2302_v63 = vmul.f32 0.5, %v154_v61  ;;  %p2113_p10 = scmp.ne.s32.totalorder %s1506_s22, %s2112_s24  ;;  %p2118_p12 = scmp.lt.s32.totalorder %s2112_s24, %s2112_s24 }
  0x44   :  { %3229 = vst [vmem:[#allocation26_spill] sm:$0xff] %v2293_v58  ;;  %3230 = vst [vmem:[#allocation27_spill] sm:$0xff] %v2296_v59 }
  0x45   :  { %208 = vmax.xlane.f32.xlu0 %v2227_v14  ;;  %3231 = vst [vmem:[#allocation28_spill] sm:$0xff] %v2299_v62  ;;  %3232 = vst [vmem:[#allocation29_spill] sm:$0xff] %v2302_v63  ;;  %p2119_p13 = por %p2118_p12, %p2117_p11 }
  0x46   :  { %210 = vmax.xlane.f32.xlu1 %v2230_v15 }
  0x47   :  { %p2120_p0 = pnand %p2119_p13, %p2113_p10 }
  0x49   :  { %244 = vmax.xlane.f32.xlu0 %v2233_v18 }
  0x4a   :  { %246 = vmax.xlane.f32.xlu1 %v2236_v19 }
  0x4d   :  { %212 = vmax.xlane.f32.xlu0 %v2239_v22 }
  0x4e   :  { %214 = vmax.xlane.f32.xlu1 %v2242_v23 }
  0x51   :  { %248 = vmax.xlane.f32.xlu0 %v2245_v26 }
  0x52   :  { %250 = vmax.xlane.f32.xlu1 %v2248_v27 }
  0x55   :  { %216 = vmax.xlane.f32.xlu0 %v2251_v30 }
  0x56   :  { %218 = vmax.xlane.f32.xlu1 %v2254_v31 }
  0x59   :  { %252 = vmax.xlane.f32.xlu0 %v2257_v34 }
  0x5a   :  { %254 = vmax.xlane.f32.xlu1 %v2260_v35 }
  0x5d   :  { %220 = vmax.xlane.f32.xlu0 %v2263_v38 }
  0x5e   :  { %222 = vmax.xlane.f32.xlu1 %v2266_v39 }
  0x61   :  { %256 = vmax.xlane.f32.xlu0 %v2269_v42 }
  0x62   :  { %258 = vmax.xlane.f32.xlu1 %v2272_v43 }
  0x65   :  { %224 = vmax.xlane.f32.xlu0 %v2275_v46 }
  0x66   :  { %226 = vmax.xlane.f32.xlu1 %v2278_v47 }
  0x69   :  { %260 = vmax.xlane.f32.xlu0 %v2281_v50 }
  0x6a   :  { %262 = vmax.xlane.f32.xlu1 %v2284_v51 }
  0x6d   :  { %228 = vmax.xlane.f32.xlu0 %v2287_v54 }
  0x6e   :  { %230 = vmax.xlane.f32.xlu1 %v2290_v55 }
  0x71   :  { %264 = vmax.xlane.f32.xlu0 %v2293_v58 }
  0x72   :  { %266 = vmax.xlane.f32.xlu1 %v2296_v59 }
  0x75   :  { %232 = vmax.xlane.f32.xlu0 %v2299_v62 }
  0x76   :  { %234 = vmax.xlane.f32.xlu1 %v2302_v63 }
  0xc6   :  { %v2306_v0 = vpop.xlane.xlu0 %236 }
  0xc7   :  { %3233 = vst [vmem:[#allocation30_spill] sm:$0xff] %v2306_v0  ;;  %v2308_v1 = vpop.xlane.xlu1 %204  ;;  %v284_v2 = vsub.f32 %v2210_v3, %v2306_v0 }
  0xc8   :  { %3234 = vst [vmem:[#allocation31_spill] sm:$0xff] %v2308_v1  ;;  %v268_v5 = vsub.f32 %v2212_v4, %v2308_v1 }
  0xc9   :  { %v332_v8 = vmul.f32 1.442695, %v284_v2 }
  0xca   :  { %v300_v9 = vmul.f32 1.442695, %v268_v5  ;;  %v2314_v12 = vpop.xlane.xlu0 %238 }
  0xcb   :  { %3235 = vst [vmem:[#allocation32_spill] sm:$0xff] %v2314_v12  ;;  %v2316_v13 = vpop.xlane.xlu1 %206  ;;  %1662 = vpow2.f32 %v332_v8  ;;  %v285_v16 = vsub.f32 %v2215_v6, %v2314_v12 }
  0xcc   :  { %3236 = vst [vmem:[#allocation33_spill] sm:$0xff] %v2316_v13  ;;  %v269_v17 = vsub.f32 %v2218_v7, %v2316_v13  ;;  %1664 = vpow2.f32 %v300_v9 }
  0xcd   :  { %v334_v20 = vmul.f32 1.442695, %v285_v16 }
  0xce   :  { %v302_v21 = vmul.f32 1.442695, %v269_v17  ;;  %v2322_v24 = vpop.xlane.xlu0 %240 }
  0xcf   :  { %3237 = vst [vmem:[#allocation34_spill] sm:$0xff] %v2322_v24  ;;  %v2324_v25 = vpop.xlane.xlu1 %242  ;;  %1666 = vpow2.f32 %v334_v20  ;;  %v286_v28 = vsub.f32 %v2221_v10, %v2322_v24 }
  0xd0   :  { %3238 = vst [vmem:[#allocation35_spill] sm:$0xff] %v2324_v25  ;;  %v287_v29 = vsub.f32 %v2224_v11, %v2324_v25  ;;  %1668 = vpow2.f32 %v302_v21 }
  0xd1   :  { %v336_v32 = vmul.f32 1.442695, %v286_v28 }
  0xd2   :  { %v338_v33 = vmul.f32 1.442695, %v287_v29  ;;  %v2330_v36 = vpop.xlane.xlu0 %208 }
  0xd3   :  { %3239 = vst [vmem:[#allocation36_spill] sm:$0xff] %v2330_v36  ;;  %v2332_v37 = vpop.xlane.xlu1 %210  ;;  %1670 = vpow2.f32 %v336_v32  ;;  %v270_v40 = vsub.f32 %v2227_v14, %v2330_v36 }
  0xd4   :  { %3240 = vst [vmem:[#allocation37_spill] sm:$0xff] %v2332_v37  ;;  %v271_v41 = vsub.f32 %v2230_v15, %v2332_v37  ;;  %1672 = vpow2.f32 %v338_v33 }
  0xd5   :  { %v2338_v44 = vpop.eup %1662  ;;  %v304_v45 = vmul.f32 1.442695, %v270_v40 }
  0xd6   :  { %v306_v48 = vmul.f32 1.442695, %v271_v41  ;;  %396 = vadd.xlane.f32.xlu0 %v2338_v44  ;;  %v2341_v49 = vpop.xlane.xlu0 %244  ;;  %v2345_v53 = vpop.eup %1664 }
  0xd7   :  { %3241 = vst [vmem:[#allocation38_spill] sm:$0xff] %v2341_v49  ;;  %v2343_v52 = vpop.xlane.xlu1 %246  ;;  %1674 = vpow2.f32 %v304_v45  ;;  %v288_v56 = vsub.f32 %v2233_v18, %v2341_v49 }
  0xd8   :  { %3242 = vst [vmem:[#allocation39_spill] sm:$0xff] %v2343_v52  ;;  %v289_v57 = vsub.f32 %v2236_v19, %v2343_v52  ;;  %1676 = vpow2.f32 %v306_v48 }
  0xd9   :  { %v2351_v60 = vpop.eup %1666  ;;  %v340_v61 = vmul.f32 1.442695, %v288_v56 }
  0xda   :  { %v342_v2 = vmul.f32 1.442695, %v289_v57  ;;  %v2353_v5 = vpop.xlane.xlu0 %212  ;;  %398 = vadd.xlane.f32.xlu1 %v2351_v60  ;;  %364 = vadd.xlane.f32.xlu0 %v2345_v53  ;;  %v2359_v9 = vpop.eup %1668 }
  0xdb   :  { %3243 = vst [vmem:[#allocation40_spill] sm:$0xff] %v2353_v5  ;;  %v2357_v8 = vpop.xlane.xlu1 %214  ;;  %1678 = vpow2.f32 %v340_v61  ;;  %v272_v16 = vsub.f32 %v2239_v22, %v2353_v5 }
  0xdc   :  { %3244 = vst [vmem:[#allocation41_spill] sm:$0xff] %v2357_v8  ;;  %v273_v17 = vsub.f32 %v2242_v23, %v2357_v8  ;;  %1680 = vpow2.f32 %v342_v2 }
  0xdd   :  { %v2365_v20 = vpop.eup %1670  ;;  %v308_v21 = vmul.f32 1.442695, %v272_v16 }
  0xde   :  { %v310_v28 = vmul.f32 1.442695, %v273_v17  ;;  %v2367_v29 = vpop.xlane.xlu0 %248  ;;  %400 = vadd.xlane.f32.xlu0 %v2365_v20  ;;  %366 = vadd.xlane.f32.xlu1 %v2359_v9  ;;  %v2373_v33 = vpop.eup %1672 }
  0xdf   :  { %3245 = vst [vmem:[#allocation42_spill] sm:$0xff] %v2367_v29  ;;  %v2371_v32 = vpop.xlane.xlu1 %250  ;;  %1682 = vpow2.f32 %v308_v21  ;;  %v290_v40 = vsub.f32 %v2245_v26, %v2367_v29 }
  0xe0   :  { %3246 = vst [vmem:[#allocation43_spill] sm:$0xff] %v2371_v32  ;;  %v291_v41 = vsub.f32 %v2248_v27, %v2371_v32  ;;  %1684 = vpow2.f32 %v310_v28 }
  0xe1   :  { %v2379_v45 = vpop.eup %1674  ;;  %v344_v48 = vmul.f32 1.442695, %v290_v40 }
  0xe2   :  { %v346_v56 = vmul.f32 1.442695, %v291_v41  ;;  %v2381_v57 = vpop.xlane.xlu0 %216  ;;  %368 = vadd.xlane.f32.xlu0 %v2379_v45  ;;  %402 = vadd.xlane.f32.xlu1 %v2373_v33  ;;  %v2387_v2 = vpop.eup %1676 }
  0xe3   :  { %3247 = vst [vmem:[#allocation44_spill] sm:$0xff] %v2381_v57  ;;  %v2385_v61 = vpop.xlane.xlu1 %218  ;;  %1686 = vpow2.f32 %v344_v48  ;;  %v274_v16 = vsub.f32 %v2251_v30, %v2381_v57 }
  0xe4   :  { %3248 = vst [vmem:[#allocation45_spill] sm:$0xff] %v2385_v61  ;;  %v275_v17 = vsub.f32 %v2254_v31, %v2385_v61  ;;  %1688 = vpow2.f32 %v346_v56 }
  0xe5   :  { %v2393_v21 = vpop.eup %1678  ;;  %v312_v28 = vmul.f32 1.442695, %v274_v16 }
  0xe6   :  { %v314_v40 = vmul.f32 1.442695, %v275_v17  ;;  %v2395_v41 = vpop.xlane.xlu0 %252  ;;  %404 = vadd.xlane.f32.xlu0 %v2393_v21  ;;  %370 = vadd.xlane.f32.xlu1 %v2387_v2  ;;  %v2401_v48 = vpop.eup %1680 }
  0xe7   :  { %3249 = vst [vmem:[#allocation46_spill] sm:$0xff] %v2395_v41  ;;  %v2399_v32 = vpop.xlane.xlu1 %254  ;;  %1690 = vpow2.f32 %v312_v28  ;;  %v292_v29 = vsub.f32 %v2257_v34, %v2395_v41 }
  0xe8   :  { %3250 = vst [vmem:[#allocation47_spill] sm:$0xff] %v2399_v32  ;;  %v293_v52 = vsub.f32 %v2260_v35, %v2399_v32  ;;  %1692 = vpow2.f32 %v314_v40 }
  0xe9   :  { %v2407_v16 = vpop.eup %1682  ;;  %v348_v56 = vmul.f32 1.442695, %v292_v29 }
  0xea   :  { %v350_v17 = vmul.f32 1.442695, %v293_v52  ;;  %v2409_v49 = vpop.xlane.xlu0 %220  ;;  %372 = vadd.xlane.f32.xlu0 %v2407_v16  ;;  %406 = vadd.xlane.f32.xlu1 %v2401_v48  ;;  %v2415_v28 = vpop.eup %1684 }
  0xeb   :  { %3251 = vst [vmem:[#allocation48_spill] sm:$0xff] %v2409_v49  ;;  %v2413_v25 = vpop.xlane.xlu1 %222  ;;  %1694 = vpow2.f32 %v348_v56  ;;  %v276_v41 = vsub.f32 %v2263_v38, %v2409_v49  ;;  %v105_v38 = vld [vmem:[#allocation9 + $0xf0] sm:$0xff] }
  0xec   :  { %3252 = vst [vmem:[#allocation49_spill] sm:$0xff] %v2413_v25  ;;  %v277_v32 = vsub.f32 %v2266_v39, %v2413_v25  ;;  %1696 = vpow2.f32 %v350_v17  ;;  %v103_v39 = vld [vmem:[#allocation9 + $0xe0] sm:$0xff] }
  0xed   :  { %v2421_v29 = vpop.eup %1686  ;;  %v316_v52 = vmul.f32 1.442695, %v276_v41 }
  0xee   :  { %v318_v40 = vmul.f32 1.442695, %v277_v32  ;;  %v2423_v24 = vpop.xlane.xlu0 %256  ;;  %408 = vadd.xlane.f32.xlu0 %v2421_v29  ;;  %374 = vadd.xlane.f32.xlu1 %v2415_v28  ;;  %v2429_v56 = vpop.eup %1688 }
  0xef   :  { %3253 = vst [vmem:[#allocation50_spill] sm:$0xff] %v2423_v24  ;;  %v2427_v12 = vpop.xlane.xlu1 %258  ;;  %1698 = vpow2.f32 %v316_v52  ;;  %v294_v0 = vsub.f32 %v2269_v42, %v2423_v24 }
  0xf0   :  { %3254 = vst [vmem:[#allocation51_spill] sm:$0xff] %v2427_v12  ;;  %v295_v25 = vsub.f32 %v2272_v43, %v2427_v12  ;;  %1700 = vpow2.f32 %v318_v40  ;;  %v3171_v43 = vmov 1.0  }
  0xf1   :  { %v2435_v41 = vpop.eup %1690  ;;  %v352_v32 = vmul.f32 1.442695, %v294_v0  ;;  %1370 = vmatprep.mubr.f32.mxu1 %v3171_v43  ;;  %1297 = vmatprep.mubr.f32.mxu0 %v3171_v43  ;;  %v101_v43 = vld [vmem:[#allocation9 + $0xd0] sm:$0xff] }
  0xf2   :  { %v354_v17 = vmul.f32 1.442695, %v295_v25  ;;  %v2437_v49 = vpop.xlane.xlu0 %224  ;;  %376 = vadd.xlane.f32.xlu0 %v2435_v41  ;;  %410 = vadd.xlane.f32.xlu1 %v2429_v56  ;;  %v2443_v52 = vpop.eup %1692 }
  0xf3   :  { %3255 = vst [vmem:[#allocation52_spill] sm:$0xff] %v2437_v49  ;;  %v2441_v61 = vpop.xlane.xlu1 %226  ;;  %1702 = vpow2.f32 %v352_v32  ;;  %v278_v24 = vsub.f32 %v2275_v46, %v2437_v49  ;;  %v90_v46 = vld [vmem:[#allocation9 + $0x78] sm:$0xff] }
  0xf4   :  { %3256 = vst [vmem:[#allocation53_spill] sm:$0xff] %v2441_v61  ;;  %v279_v12 = vsub.f32 %v2278_v47, %v2441_v61  ;;  %1704 = vpow2.f32 %v354_v17  ;;  %v89_v47 = vld [vmem:[#allocation9 + $0x70] sm:$0xff] }
  0xf5   :  { %v2449_v0 = vpop.eup %1694  ;;  %v320_v25 = vmul.f32 1.442695, %v278_v24 }
  0xf6   :  { %3257 = vst [vmem:[#allocation54_spill] sm:$0xff] %v2449_v0  ;;  %v322_v40 = vmul.f32 1.442695, %v279_v12  ;;  %v2451_v57 = vpop.xlane.xlu0 %260  ;;  %412 = vadd.xlane.f32.xlu0 %v2449_v0  ;;  %378 = vadd.xlane.f32.xlu1 %v2443_v52  ;;  %v2457_v32 = vpop.eup %1696 }
  0xf7   :  { %3258 = vst [vmem:[#allocation55_spill] sm:$0xff] %v2451_v57  ;;  %v2455_v8 = vpop.xlane.xlu1 %262  ;;  %3260 = vst [vmem:[#allocation57_spill] sm:$0xff] %v2457_v32  ;;  %1706 = vpow2.f32 %v320_v25  ;;  %v296_v49 = vsub.f32 %v2281_v50, %v2451_v57  ;;  %v86_v50 = vld [vmem:[#allocation9 + $0x58] sm:$0xff] }
  0xf8   :  { %3259 = vst [vmem:[#allocation56_spill] sm:$0xff] %v2455_v8  ;;  %v297_v61 = vsub.f32 %v2284_v51, %v2455_v8  ;;  %1708 = vpow2.f32 %v322_v40  ;;  %v85_v51 = vld [vmem:[#allocation9 + $0x50] sm:$0xff] }
  0xf9   :  { %v2463_v24 = vpop.eup %1698  ;;  %v356_v12 = vmul.f32 1.442695, %v296_v49 }
  0xfa   :  { %3261 = vst [vmem:[#allocation58_spill] sm:$0xff] %v2463_v24  ;;  %v358_v17 = vmul.f32 1.442695, %v297_v61  ;;  %v2465_v5 = vpop.xlane.xlu0 %228  ;;  %380 = vadd.xlane.f32.xlu0 %v2463_v24  ;;  %414 = vadd.xlane.f32.xlu1 %v2457_v32  ;;  %v2471_v25 = vpop.eup %1700  ;;  %v102_v24 = vld [vmem:[#allocation9 + $0xd8] sm:$0xff] }
  0xfb   :  { %3262 = vst [vmem:[#allocation59_spill] sm:$0xff] %v2465_v5  ;;  %v2469_v37 = vpop.xlane.xlu1 %230  ;;  %3264 = vst [vmem:[#allocation61_spill] sm:$0xff] %v2471_v25  ;;  %1710 = vpow2.f32 %v356_v12  ;;  %v280_v57 = vsub.f32 %v2287_v54, %v2465_v5  ;;  %v81_v54 = vld [vmem:[#allocation9 + $0x30] sm:$0xff] }
  0xfc   :  { %3263 = vst [vmem:[#allocation60_spill] sm:$0xff] %v2469_v37  ;;  %v281_v8 = vsub.f32 %v2290_v55, %v2469_v37  ;;  %1712 = vpow2.f32 %v358_v17 }
  0xfd   :  { %v2477_v49 = vpop.eup %1702  ;;  %v324_v61 = vmul.f32 1.442695, %v280_v57 }
  0xfe   :  { %3265 = vst [vmem:[#allocation62_spill] sm:$0xff] %v2477_v49  ;;  %v326_v40 = vmul.f32 1.442695, %v281_v8  ;;  %v2479_v36 = vpop.xlane.xlu0 %264  ;;  %416 = vadd.xlane.f32.xlu0 %v2477_v49  ;;  %382 = vadd.xlane.f32.xlu1 %v2471_v25  ;;  %v2485_v12 = vpop.eup %1704  ;;  %v93_v49 = vld [vmem:[#allocation9 + $0x90] sm:$0xff]  ;;  %v100_v25 = vld [vmem:[#allocation9 + $0xc8] sm:$0xff] }
  0xff   :  { %3266 = vst [vmem:[#allocation63_spill] sm:$0xff] %v2479_v36  ;;  %v2483_v13 = vpop.xlane.xlu1 %266  ;;  %3268 = vst [vmem:[#allocation65_spill] sm:$0xff] %v2485_v12  ;;  %1714 = vpow2.f32 %v324_v61  ;;  %v298_v5 = vsub.f32 %v2293_v58, %v2479_v36 }
 0x100   :  { %3267 = vst [vmem:[#allocation64_spill] sm:$0xff] %v2483_v13  ;;  %v299_v37 = vsub.f32 %v2296_v59, %v2483_v13  ;;  %1716 = vpow2.f32 %v326_v40 }
 0x101   :  { %v2491_v57 = vpop.eup %1706  ;;  %v360_v8 = vmul.f32 1.442695, %v298_v5 }
 0x102   :  { %3269 = vst [vmem:[#allocation66_spill] sm:$0xff] %v2491_v57  ;;  %v362_v17 = vmul.f32 1.442695, %v299_v37  ;;  %v2493_v1 = vpop.xlane.xlu0 %232  ;;  %384 = vadd.xlane.f32.xlu0 %v2491_v57  ;;  %418 = vadd.xlane.f32.xlu1 %v2485_v12  ;;  %v2499_v61 = vpop.eup %1708  ;;  %v88_v57 = vld [vmem:[#allocation9 + $0x68] sm:$0xff]  ;;  %v91_v12 = vld [vmem:[#allocation9 + $0x80] sm:$0xff] }
 0x103   :  { %3270 = vst [vmem:[#allocation67_spill] sm:$0xff] %v2493_v1  ;;  %v2497_v55 = vpop.xlane.xlu1 %234  ;;  %3272 = vst [vmem:[#allocation69_spill] sm:$0xff] %v2499_v61  ;;  %1718 = vpow2.f32 %v360_v8  ;;  %v282_v36 = vsub.f32 %v2299_v62, %v2493_v1  ;;  %v76_v1 = vld [vmem:[#allocation9 + $0x8] sm:$0xff] }
 0x104   :  { %3271 = vst [vmem:[#allocation68_spill] sm:$0xff] %v2497_v55  ;;  %v283_v13 = vsub.f32 %v2302_v63, %v2497_v55  ;;  %1720 = vpow2.f32 %v362_v17  ;;  %v77_v63 = vld [vmem:[#allocation9 + $0x10] sm:$0xff]  ;;  %v2533_v62 = vmul.f32 0.5, %v76_v1 }
 0x105   :  { %v2505_v5 = vpop.eup %1710  ;;  %v328_v37 = vmul.f32 1.442695, %v282_v36  ;;  %v75_v36 = vld [vmem:[#allocation9] sm:$0xff] }
 0x106   :  { %3273 = vst [vmem:[#allocation70_spill] sm:$0xff] %v2505_v5  ;;  %v330_v40 = vmul.f32 1.442695, %v283_v13  ;;  %420 = vadd.xlane.f32.xlu0 %v2505_v5  ;;  %386 = vadd.xlane.f32.xlu1 %v2499_v61  ;;  %v2509_v59 = vpop.eup %1712  ;;  %v84_v5 = vld [vmem:[#allocation9 + $0x48] sm:$0xff]  ;;  %v87_v61 = vld [vmem:[#allocation9 + $0x60] sm:$0xff]  ;;  %v1170_v32 = vsub.f32 %v2218_v7, %v2533_v62 }
 0x107   :  { %3274 = vst [vmem:[#allocation71_spill] sm:$0xff] %v2509_v59  ;;  %1722 = vpow2.f32 %v328_v37  ;;  %v2527_v37 = vmul.f32 0.5, %v75_v36 }
 0x108   :  { %1724 = vpow2.f32 %v330_v40 }
 0x109   :  { %v2511_v58 = vpop.eup %1714 }
 0x10a   :  { %3275 = vst [vmem:[#allocation72_spill] sm:$0xff] %v2511_v58  ;;  %388 = vadd.xlane.f32.xlu0 %v2511_v58  ;;  %422 = vadd.xlane.f32.xlu1 %v2509_v59  ;;  %v2515_v8 = vpop.eup %1716  ;;  %v79_v58 = vld [vmem:[#allocation9 + $0x20] sm:$0xff] }
 0x10b   :  { %3276 = vst [vmem:[#allocation73_spill] sm:$0xff] %v2515_v8  ;;  %v83_v59 = vld [vmem:[#allocation9 + $0x40] sm:$0xff] }
 0x10d   :  { %v2517_v55 = vpop.eup %1718 }
 0x10e   :  { %3277 = vst [vmem:[#allocation74_spill] sm:$0xff] %v2517_v55  ;;  %424 = vadd.xlane.f32.xlu0 %v2517_v55  ;;  %390 = vadd.xlane.f32.xlu1 %v2515_v8  ;;  %v2521_v13 = vpop.eup %1720  ;;  %v2535_v55 = vmul.f32 0.5, %v77_v63  ;;  %v78_v8 = vld [vmem:[#allocation9 + $0x18] sm:$0xff]  ;;  %v2547_v63 = vmul.f32 0.5, %v81_v54  ;;  %v2559_v54 = vmul.f32 0.5, %v85_v51  ;;  %v2571_v51 = vmul.f32 0.5, %v89_v47 }
 0x10f   :  { %3278 = vst [vmem:[#allocation75_spill] sm:$0xff] %v2521_v13  ;;  %v2539_v36 = vmul.f32 0.5, %v78_v8  ;;  %v2583_v47 = vmul.f32 0.5, %v93_v49 }
 0x110   :  { %3283 = vst [vmem:[#allocation80_spill] sm:$0xff] %v2559_v54  ;;  %3287 = vst [vmem:[#allocation84_spill] sm:$0xff] %v2571_v51 }
 0x111   :  { %v2523_v17 = vpop.eup %1722  ;;  %v1187_v7 = vsub.f32 %v2221_v10, %v2583_v47 }
 0x112   :  { %3279 = vst [vmem:[#allocation76_spill] sm:$0xff] %v2523_v17  ;;  %392 = vadd.xlane.f32.xlu0 %v2523_v17  ;;  %426 = vadd.xlane.f32.xlu1 %v2521_v13  ;;  %v2529_v40 = vpop.eup %1724  ;;  %v2541_v17 = vmul.f32 0.5, %v79_v58  ;;  %v80_v13 = vld [vmem:[#allocation9 + $0x28] sm:$0xff]  ;;  %v2553_v58 = vmul.f32 0.5, %v83_v59  ;;  %v2565_v59 = vmul.f32 0.5, %v87_v61  ;;  %v2577_v61 = vmul.f32 0.5, %v91_v12 }
 0x113   :  { %3280 = vst [vmem:[#allocation77_spill] sm:$0xff] %v2529_v40  ;;  %v2545_v1 = vmul.f32 0.5, %v80_v13  ;;  %v2557_v13 = vmul.f32 0.5, %v84_v5  ;;  %v2569_v5 = vmul.f32 0.5, %v88_v57 }
 0x114   :  { %3281 = vst [vmem:[#allocation78_spill] sm:$0xff] %v2553_v58  ;;  %3285 = vst [vmem:[#allocation82_spill] sm:$0xff] %v2565_v59 }
 0x115   :  { %3282 = vst [vmem:[#allocation79_spill] sm:$0xff] %v2557_v13  ;;  %3286 = vst [vmem:[#allocation83_spill] sm:$0xff] %v2569_v5 }
 0x116   :  { %394 = vadd.xlane.f32.xlu1 %v2529_v40  ;;  %524 = vmax.xlane.f32.xlu0 %v2527_v37  ;;  %v82_v40 = vld [vmem:[#allocation9 + $0x38] sm:$0xff]  ;;  %3289 = vst [vmem:[#allocation86_spill] sm:$0xff] %v2577_v61 }
 0x117   :  { %v2551_v8 = vmul.f32 0.5, %v82_v40  ;;  %v2563_v40 = vmul.f32 0.5, %v86_v50  ;;  %v2575_v50 = vmul.f32 0.5, %v90_v46 }
 0x119   :  { %3284 = vst [vmem:[#allocation81_spill] sm:$0xff] %v2563_v40  ;;  %3288 = vst [vmem:[#allocation85_spill] sm:$0xff] %v2575_v50 }
 0x11a   :  { %526 = vmax.xlane.f32.xlu1 %v2533_v62  ;;  %528 = vmax.xlane.f32.xlu0 %v2535_v55 }
 0x11e   :  { %530 = vmax.xlane.f32.xlu1 %v2539_v36  ;;  %532 = vmax.xlane.f32.xlu0 %v2541_v17 }
 0x122   :  { %534 = vmax.xlane.f32.xlu1 %v2545_v1  ;;  %536 = vmax.xlane.f32.xlu0 %v2547_v63 }
 0x126   :  { %538 = vmax.xlane.f32.xlu1 %v2551_v8  ;;  %540 = vmax.xlane.f32.xlu0 %v2553_v58  ;;  %v106_v58 = vld [vmem:[#allocation9 + $0xf8] sm:$0xff] }
 0x12a   :  { %542 = vmax.xlane.f32.xlu1 %v2557_v13  ;;  %544 = vmax.xlane.f32.xlu0 %v2559_v54  ;;  %v92_v54 = vld [vmem:[#allocation9 + $0x88] sm:$0xff] }
 0x12b   :  { %v2581_v57 = vmul.f32 0.5, %v92_v54  ;;  %v104_v13 = vld [vmem:[#allocation9 + $0xe8] sm:$0xff] }
 0x12d   :  { %3290 = vst [vmem:[#allocation87_spill] sm:$0xff] %v2581_v57 }
 0x12e   :  { %546 = vmax.xlane.f32.xlu1 %v2563_v40  ;;  %548 = vmax.xlane.f32.xlu0 %v2565_v59  ;;  %v94_v59 = vld [vmem:[#allocation9 + $0x98] sm:$0xff]  ;;  %v95_v40 = vld [vmem:[#allocation9 + $0xa0] sm:$0xff] }
 0x12f   :  { %v2587_v46 = vmul.f32 0.5, %v94_v59  ;;  %v2589_v12 = vmul.f32 0.5, %v95_v40  ;;  %v99_v59 = vld [vmem:[#allocation9 + $0xc0] sm:$0xff] }
 0x130   :  { %v2603_v42 = vmul.f32 0.5, %v99_v59  ;;  %v2615_v59 = vmul.f32 0.5, %v103_v39 }
 0x132   :  { %550 = vmax.xlane.f32.xlu1 %v2569_v5  ;;  %552 = vmax.xlane.f32.xlu0 %v2571_v51  ;;  %v96_v51 = vld [vmem:[#allocation9 + $0xa8] sm:$0xff]  ;;  %v97_v5 = vld [vmem:[#allocation9 + $0xb0] sm:$0xff]  ;;  %3293 = vst [vmem:[#allocation90_spill] sm:$0xff] %v2615_v59 }
 0x133   :  { %v2595_v49 = vmul.f32 0.5, %v96_v51  ;;  %v2597_v54 = vmul.f32 0.5, %v97_v5  ;;  %v2607_v51 = vmul.f32 0.5, %v100_v25  ;;  %v2609_v5 = vmul.f32 0.5, %v101_v43 }
 0x134   :  { %v2619_v25 = vmul.f32 0.5, %v104_v13  ;;  %v2621_v43 = vmul.f32 0.5, %v105_v38 }
 0x135   :  { %3291 = vst [vmem:[#allocation88_spill] sm:$0xff] %v2609_v5 }
 0x136   :  { %554 = vmax.xlane.f32.xlu1 %v2575_v50  ;;  %556 = vmax.xlane.f32.xlu0 %v2577_v61  ;;  %v98_v50 = vld [vmem:[#allocation9 + $0xb8] sm:$0xff]  ;;  %3294 = vst [vmem:[#allocation91_spill] sm:$0xff] %v2619_v25  ;;  %3295 = vst [vmem:[#allocation92_spill] sm:$0xff] %v2621_v43 }
 0x137   :  { %v2601_v40 = vmul.f32 0.5, %v98_v50  ;;  %v2613_v50 = vmul.f32 0.5, %v102_v24 }
 0x139   :  { %3292 = vst [vmem:[#allocation89_spill] sm:$0xff] %v2613_v50 }
 0x13a   :  { %558 = vmax.xlane.f32.xlu1 %v2581_v57  ;;  %560 = vmax.xlane.f32.xlu0 %v2583_v47 }
 0x13e   :  { %562 = vmax.xlane.f32.xlu1 %v2587_v46  ;;  %564 = vmax.xlane.f32.xlu0 %v2589_v12 }
 0x142   :  { %566 = vmax.xlane.f32.xlu1 %v2595_v49  ;;  %568 = vmax.xlane.f32.xlu0 %v2597_v54 }
 0x146   :  { %570 = vmax.xlane.f32.xlu1 %v2601_v40  ;;  %572 = vmax.xlane.f32.xlu0 %v2603_v42 }
 0x14a   :  { %574 = vmax.xlane.f32.xlu1 %v2607_v51  ;;  %576 = vmax.xlane.f32.xlu0 %v2609_v5  ;;  %v2625_v5 = vmul.f32 0.5, %v106_v58 }
 0x14c   :  { %3296 = vst [vmem:[#allocation93_spill] sm:$0xff] %v2625_v5 }
 0x14e   :  { %578 = vmax.xlane.f32.xlu1 %v2613_v50  ;;  %580 = vmax.xlane.f32.xlu0 %v2615_v59 }
 0x152   :  { %582 = vmax.xlane.f32.xlu1 %v2619_v25  ;;  %584 = vmax.xlane.f32.xlu0 %v2621_v43 }
 0x156   :  { %586 = vmax.xlane.f32.xlu1 %v2625_v5 }
 0x163   :  { %v2628_v39 = vpop.xlane.xlu0 %396 }
 0x164   :  { %3297 = vst [vmem:[#allocation94_spill] sm:$0xff] %v2628_v39  ;;  %1726 = vrcp.f32 %v2628_v39 }
 0x167   :  { %v2631_v24 = vpop.xlane.xlu0 %364  ;;  %v2633_v59 = vpop.xlane.xlu1 %398 }
 0x168   :  { %3298 = vst [vmem:[#allocation95_spill] sm:$0xff] %v2631_v24  ;;  %3299 = vst [vmem:[#allocation96_spill] sm:$0xff] %v2633_v59  ;;  %1728 = vrcp.f32 %v2631_v24 }
 0x169   :  { %1730 = vrcp.f32 %v2633_v59 }
 0x16b   :  { %v2637_v38 = vpop.xlane.xlu0 %400  ;;  %v2639_v13 = vpop.xlane.xlu1 %366 }
 0x16c   :  { %3300 = vst [vmem:[#allocation97_spill] sm:$0xff] %v2637_v38  ;;  %3301 = vst [vmem:[#allocation98_spill] sm:$0xff] %v2639_v13  ;;  %1732 = vrcp.f32 %v2637_v38  ;;  %v1185_v38 = vsub.f32 %v2210_v3, %v2577_v61 }
 0x16d   :  { %1734 = vrcp.f32 %v2639_v13  ;;  %v1186_v13 = vsub.f32 %v2215_v6, %v2581_v57 }
 0x16e   :  { %v1727_v39 = vpop.eup %1726 }
 0x16f   :  { %v2643_v58 = vpop.xlane.xlu0 %368  ;;  %v2645_v5 = vpop.xlane.xlu1 %402  ;;  %v508_v25 = vmul.f32 %v1727_v39, %v2338_v44 }
 0x170   :  { %3302 = vst [vmem:[#allocation99_spill] sm:$0xff] %v2643_v58  ;;  %3303 = vst [vmem:[#allocation100_spill] sm:$0xff] %v2645_v5  ;;  %1736 = vrcp.f32 %v2643_v58 }
 0x171   :  { %1738 = vrcp.f32 %v2645_v5  ;;  %v1169_v5 = vsub.f32 %v2212_v4, %v2527_v37  ;;  %v1217_v6 = vmul.f32 %v1185_v38, %v508_v25 }
 0x172   :  { %v1729_v24 = vpop.eup %1728 }
 0x173   :  { %v2649_v43 = vpop.xlane.xlu0 %404  ;;  %v2651_v59 = vpop.xlane.xlu1 %370 }
 0x174   :  { %3304 = vst [vmem:[#allocation101_spill] sm:$0xff] %v2649_v43  ;;  %3305 = vst [vmem:[#allocation102_spill] sm:$0xff] %v2651_v59  ;;  %v1731_v50 = vpop.eup %1730  ;;  %1740 = vrcp.f32 %v2649_v43  ;;  %v492_v43 = vmul.f32 %v1729_v24, %v2345_v53 }
 0x175   :  { %v509_v58 = vmul.f32 %v1731_v50, %v2351_v60  ;;  %1742 = vrcp.f32 %v2651_v59  ;;  %v1188_v50 = vsub.f32 %v2224_v11, %v2587_v46  ;;  %v1171_v11 = vsub.f32 %v2227_v14, %v2535_v55 }
 0x176   :  { %v1733_v44 = vpop.eup %1732  ;;  %v1201_v38 = vmul.f32 %v1169_v5, %v492_v43 }
 0x177   :  { %v2665_v39 = vpop.xlane.xlu0 %372  ;;  %v1618_v3 = vpack.c.bf16 %v509_v58, %v508_v25  ;;  %v2667_v61 = vpop.xlane.xlu1 %406  ;;  %v1218_v57 = vmul.f32 %v1186_v13, %v509_v58  ;;  %v1172_v58 = vsub.f32 %v2230_v15, %v2539_v36  ;;  %v1189_v15 = vsub.f32 %v2233_v18, %v2589_v12 }
 0x178   :  { %3306 = vst [vmem:[#allocation103_spill] sm:$0xff] %v2667_v61  ;;  %v1735_v0 = vpop.eup %1734  ;;  %1744 = vrcp.f32 %v2665_v39 }
 0x179   :  { %1619 = vmatprep.subr.bf16.mxu1 %v1618_v3  ;;  %v1586_v60 = vpack.c.bf16 %v1218_v57, %v1217_v6  ;;  %v493_v4 = vmul.f32 %v1735_v0, %v2359_v9  ;;  %1746 = vrcp.f32 %v2667_v61  ;;  %v510_v57 = vmul.f32 %v1733_v44, %v2365_v20  ;;  %v3363_v61 = vld [vmem:[#allocation77_spill] sm:$0xff] }
 0x17a   :  { %v1737_v59 = vpop.eup %1736 }
 0x17b   :  { %1587 = vmatprep.subr.bf16.mxu0 %v1586_v60  ;;  %v2677_v25 = vpop.xlane.xlu0 %408  ;;  %v1620_v53 = vpack.c.bf16 %v493_v4, %v492_v43  ;;  %v2679_v24 = vpop.xlane.xlu1 %374  ;;  %v1202_v13 = vmul.f32 %v1170_v32, %v493_v4  ;;  %v1219_v43 = vmul.f32 %v1187_v7, %v510_v57  ;;  %v494_v6 = vmul.f32 %v1737_v59, %v2379_v45 }
 0x17c   :  { %3307 = vst [vmem:[#allocation104_spill] sm:$0xff] %v2677_v25  ;;  %v1739_v9 = vpop.eup %1738  ;;  %1748 = vrcp.f32 %v2677_v25  ;;  %v1190_v4 = vsub.f32 %v2236_v19, %v2595_v49  ;;  %v1173_v19 = vsub.f32 %v2239_v22, %v2541_v17 }
 0x17d   :  { %1621 = vmatpush3.bf16.msra.mxu1 %v1620_v53  ;;  %v1588_v0 = vpack.c.bf16 %v1202_v13, %v1201_v38  ;;  %v511_v10 = vmul.f32 %v1739_v9, %v2373_v33  ;;  %1750 = vrcp.f32 %v2679_v24  ;;  %v1174_v9 = vsub.f32 %v2242_v23, %v2545_v1 }
 0x17e   :  { %v1741_v3 = vpop.eup %1740  ;;  %v1191_v23 = vsub.f32 %v2245_v26, %v2597_v54 }
 0x17f   :  { %1589 = vmatpush3.bf16.msra.mxu0 %v1588_v0  ;;  %v2689_v32 = vpop.xlane.xlu0 %376  ;;  %v1622_v20 = vpack.c.bf16 %v511_v10, %v510_v57  ;;  %v2691_v5 = vpop.xlane.xlu1 %410  ;;  %v1220_v44 = vmul.f32 %v1188_v50, %v511_v10  ;;  %v1203_v50 = vmul.f32 %v1171_v11, %v494_v6  ;;  %v512_v13 = vmul.f32 %v1741_v3, %v2393_v21 }
 0x180   :  { %3308 = vst [vmem:[#allocation105_spill] sm:$0xff] %v2691_v5  ;;  %v1743_v33 = vpop.eup %1742  ;;  %1752 = vrcp.f32 %v2689_v32 }
 0x181   :  { %1623 = vmatprep.subr.bf16.mxu1 %v1622_v20  ;;  %v1590_v60 = vpack.c.bf16 %v1220_v44, %v1219_v43  ;;  %v495_v14 = vmul.f32 %v1743_v33, %v2387_v2  ;;  %1754 = vrcp.f32 %v2691_v5  ;;  %v1192_v44 = vsub.f32 %v2248_v27, %v2601_v40 }
 0x182   :  { %v1745_v53 = vpop.eup %1744  ;;  %v1175_v27 = vsub.f32 %v2251_v30, %v2547_v63 }
 0x183   :  { %1591 = vmatprep.subr.bf16.mxu0 %v1590_v60  ;;  %v2701_v7 = vpop.xlane.xlu0 %412  ;;  %v1624_v45 = vpack.c.bf16 %v495_v14, %v494_v6  ;;  %v2703_v59 = vpop.xlane.xlu1 %378  ;;  %v1204_v38 = vmul.f32 %v1172_v58, %v495_v14  ;;  %v1221_v58 = vmul.f32 %v1189_v15, %v512_v13  ;;  %v496_v20 = vmul.f32 %v1745_v53, %v2407_v16 }
 0x184   :  { %3309 = vst [vmem:[#allocation106_spill] sm:$0xff] %v2701_v7  ;;  %v1747_v2 = vpop.eup %1746  ;;  %1756 = vrcp.f32 %v2701_v7  ;;  %v3349_v7 = vld [vmem:[#allocation25_spill] sm:$0xff] }
 0x185   :  { %1625 = vmatpush3.bf16.msra.mxu1 %v1624_v45  ;;  %v1592_v57 = vpack.c.bf16 %v1204_v38, %v1203_v50  ;;  %v513_v18 = vmul.f32 %v1747_v2, %v2401_v48  ;;  %1758 = vrcp.f32 %v2703_v59  ;;  %v1205_v14 = vmul.f32 %v1173_v19, %v496_v20 }
 0x186   :  { %v1749_v0 = vpop.eup %1748  ;;  %v1176_v45 = vsub.f32 %v2254_v31, %v2551_v8  ;;  %v1193_v31 = vsub.f32 %v2257_v34, %v2603_v42  ;;  %v3315_v34 = vld [vmem:[#allocation57_spill] sm:$0xff] }
 0x187   :  { %1593 = vmatpush3.bf16.msra.mxu0 %v1592_v57  ;;  %v2713_v10 = vpop.xlane.xlu0 %380  ;;  %v1626_v21 = vpack.c.bf16 %v513_v18, %v512_v13  ;;  %v2715_v11 = vpop.xlane.xlu1 %414  ;;  %v1222_v3 = vmul.f32 %v1190_v4, %v513_v18  ;;  %v514_v4 = vmul.f32 %v1749_v0, %v2421_v29 }
 0x188   :  { %3310 = vst [vmem:[#allocation107_spill] sm:$0xff] %v2715_v11  ;;  %v1751_v48 = vpop.eup %1750  ;;  %1760 = vrcp.f32 %v2713_v10 }
 0x189   :  { %1627 = vmatprep.subr.bf16.mxu1 %v1626_v21  ;;  %v1594_v43 = vpack.c.bf16 %v1222_v3, %v1221_v58  ;;  %v497_v22 = vmul.f32 %v1751_v48, %v2415_v28  ;;  %1762 = vrcp.f32 %v2715_v11  ;;  %v1223_v2 = vmul.f32 %v1191_v23, %v514_v4  ;;  %v3314_v48 = vld [vmem:[#allocation54_spill] sm:$0xff]  ;;  %v3348_v11 = vld [vmem:[#allocation83_spill] sm:$0xff] }
 0x18a   :  { %v1753_v6 = vpop.eup %1752 }
 0x18b   :  { %1595 = vmatprep.subr.bf16.mxu0 %v1594_v43  ;;  %v2725_v33 = vpop.xlane.xlu0 %416  ;;  %v1628_v16 = vpack.c.bf16 %v497_v22, %v496_v20  ;;  %v2727_v60 = vpop.xlane.xlu1 %382  ;;  %v1206_v15 = vmul.f32 %v1174_v9, %v497_v22  ;;  %v498_v18 = vmul.f32 %v1753_v6, %v2435_v41  ;;  %v1194_v9 = vsub.f32 %v2260_v35, %v2607_v51  ;;  %v3316_v35 = vld [vmem:[#allocation78_spill] sm:$0xff] }
 0x18c   :  { %3311 = vst [vmem:[#allocation108_spill] sm:$0xff] %v2725_v33  ;;  %v1755_v28 = vpop.eup %1754  ;;  %1764 = vrcp.f32 %v2725_v33 }
 0x18d   :  { %1629 = vmatpush3.bf16.msra.mxu1 %v1628_v16  ;;  %v1596_v53 = vpack.c.bf16 %v1206_v15, %v1205_v14  ;;  %v515_v26 = vmul.f32 %v1755_v28, %v2429_v56  ;;  %1766 = vrcp.f32 %v2727_v60  ;;  %v1207_v3 = vmul.f32 %v1175_v27, %v498_v18  ;;  %v3318_v16 = vld [vmem:[#allocation79_spill] sm:$0xff]  ;;  %v3319_v14 = vld [vmem:[#allocation17_spill] sm:$0xff] }
 0x18e   :  { %v1757_v50 = vpop.eup %1756  ;;  %v1178_v15 = vsub.f32 %v3319_v14, %v3318_v16 }
 0x18f   :  { %1597 = vmatpush3.bf16.msra.mxu0 %v1596_v53  ;;  %v2737_v38 = vpop.xlane.xlu0 %384  ;;  %v1630_v29 = vpack.c.bf16 %v515_v26, %v514_v4  ;;  %v2739_v13 = vpop.xlane.xlu1 %418  ;;  %v1224_v57 = vmul.f32 %v1192_v44, %v515_v26  ;;  %v516_v43 = vmul.f32 %v1757_v50, %v3314_v48  ;;  %v3317_v44 = vld [vmem:[#allocation16_spill] sm:$0xff]  ;;  %v3321_v50 = vld [vmem:[#allocation58_spill] sm:$0xff] }
 0x190   :  { %3312 = vst [vmem:[#allocation109_spill] sm:$0xff] %v2739_v13  ;;  %v1759_v56 = vpop.eup %1758  ;;  %1768 = vrcp.f32 %v2737_v38  ;;  %v1177_v6 = vsub.f32 %v3317_v44, %v3316_v35 }
 0x191   :  { %1631 = vmatprep.subr.bf16.mxu1 %v1630_v29  ;;  %v1598_v19 = vpack.c.bf16 %v1224_v57, %v1223_v2  ;;  %v499_v30 = vmul.f32 %v1759_v56, %v2443_v52  ;;  %1770 = vrcp.f32 %v2739_v13  ;;  %v1225_v27 = vmul.f32 %v1193_v31, %v516_v43  ;;  %v3347_v13 = vld [vmem:[#allocation24_spill] sm:$0xff] }
 0x192   :  { %v1761_v0 = vpop.eup %1760 }
 0x193   :  { %1599 = vmatprep.subr.bf16.mxu0 %v1598_v19  ;;  %v2749_v21 = vpop.xlane.xlu0 %420  ;;  %v1632_v41 = vpack.c.bf16 %v499_v30, %v498_v18  ;;  %v2751_v58 = vpop.xlane.xlu1 %386  ;;  %v1208_v20 = vmul.f32 %v1176_v45, %v499_v30  ;;  %v500_v29 = vmul.f32 %v1761_v0, %v3321_v50  ;;  %v3322_v18 = vld [vmem:[#allocation61_spill] sm:$0xff]  ;;  %v3323_v19 = vld [vmem:[#allocation88_spill] sm:$0xff]  ;;  %v3324_v30 = vld [vmem:[#allocation18_spill] sm:$0xff] }
 0x194   :  { %3313 = vst [vmem:[#allocation110_spill] sm:$0xff] %v2749_v21  ;;  %v1763_v52 = vpop.eup %1762  ;;  %1772 = vrcp.f32 %v2749_v21  ;;  %v3332_v50 = vld [vmem:[#allocation20_spill] sm:$0xff]  ;;  %v3342_v21 = vld [vmem:[#allocation23_spill] sm:$0xff] }
 0x195   :  { %1633 = vmatpush3.bf16.msra.mxu1 %v1632_v41  ;;  %v1600_v22 = vpack.c.bf16 %v1208_v20, %v1207_v3  ;;  %v517_v23 = vmul.f32 %v1763_v52, %v3315_v34  ;;  %1774 = vrcp.f32 %v2751_v58  ;;  %v1195_v41 = vsub.f32 %v3324_v30, %v3323_v19  ;;  %v3325_v3 = vld [vmem:[#allocation89_spill] sm:$0xff]  ;;  %v3326_v20 = vld [vmem:[#allocation19_spill] sm:$0xff]  ;;  %v3329_v34 = vld [vmem:[#allocation62_spill] sm:$0xff] }
 0x196   :  { %v1765_v4 = vpop.eup %1764  ;;  %v1196_v48 = vsub.f32 %v3326_v20, %v3325_v3 }
 0x197   :  { %1601 = vmatpush3.bf16.msra.mxu0 %v1600_v22  ;;  %v2761_v28 = vpop.xlane.xlu0 %388  ;;  %v1634_v53 = vpack.c.bf16 %v517_v23, %v516_v43  ;;  %v2763_v26 = vpop.xlane.xlu1 %422  ;;  %v1226_v45 = vmul.f32 %v1194_v9, %v517_v23  ;;  %v1209_v43 = vmul.f32 %v1177_v6, %v500_v29  ;;  %v518_v23 = vmul.f32 %v1765_v4, %v3329_v34  ;;  %v3338_v34 = vld [vmem:[#allocation69_spill] sm:$0xff] }
 0x198   :  { %3320 = vst [vmem:[#allocation54_spill] sm:$0xff] %v2763_v26  ;;  %v1767_v2 = vpop.eup %1766  ;;  %1776 = vrcp.f32 %v2761_v28 }
 0x199   :  { %1635 = vmatprep.subr.bf16.mxu1 %v1634_v53  ;;  %v1602_v57 = vpack.c.bf16 %v1226_v45, %v1225_v27  ;;  %v501_v56 = vmul.f32 %v1767_v2, %v3322_v18  ;;  %1778 = vrcp.f32 %v2763_v26  ;;  %v3330_v53 = vld [vmem:[#allocation65_spill] sm:$0xff]  ;;  %v3331_v45 = vld [vmem:[#allocation80_spill] sm:$0xff]  ;;  %v1227_v4 = vmul.f32 %v1195_v41, %v518_v23 }
 0x19a   :  { %v1769_v52 = vpop.eup %1768  ;;  %v1179_v2 = vsub.f32 %v3332_v50, %v3331_v45  ;;  %v3334_v18 = vld [vmem:[#allocation21_spill] sm:$0xff] }
 0x19b   :  { %1603 = vmatprep.subr.bf16.mxu0 %v1602_v57  ;;  %v2773_v31 = vpop.xlane.xlu0 %424  ;;  %v1636_v9 = vpack.c.bf16 %v501_v56, %v500_v29  ;;  %v2775_v0 = vpop.xlane.xlu1 %390  ;;  %v1210_v22 = vmul.f32 %v1178_v15, %v501_v56  ;;  %v3333_v57 = vld [vmem:[#allocation81_spill] sm:$0xff]  ;;  %v3337_v56 = vld [vmem:[#allocation66_spill] sm:$0xff] }
 0x19c   :  { %3327 = vst [vmem:[#allocation57_spill] sm:$0xff] %v2773_v31  ;;  %3328 = vst [vmem:[#allocation78_spill] sm:$0xff] %v2775_v0  ;;  %v1771_v44 = vpop.eup %1770  ;;  %1780 = vrcp.f32 %v2775_v0  ;;  %v1180_v30 = vsub.f32 %v3334_v18, %v3333_v57  ;;  %v3341_v18 = vld [vmem:[#allocation91_spill] sm:$0xff] }
 0x19d   :  { %1637 = vmatpush3.bf16.msra.mxu1 %v1636_v9  ;;  %v1604_v14 = vpack.c.bf16 %v1210_v22, %v1209_v43  ;;  %v519_v27 = vmul.f32 %v1771_v44, %v3330_v53  ;;  %v502_v9 = vmul.f32 %v1769_v52, %v3337_v56  ;;  %1782 = vrcp.f32 %v2773_v31  ;;  %v3340_v53 = vld [vmem:[#allocation22_spill] sm:$0xff] }
 0x19e   :  { %v1773_v20 = vpop.eup %1772  ;;  %v1198_v41 = vsub.f32 %v3342_v21, %v3341_v18  ;;  %v3345_v21 = vld [vmem:[#allocation71_spill] sm:$0xff]  ;;  %v3346_v31 = vld [vmem:[#allocation82_spill] sm:$0xff] }
 0x19f   :  { %1605 = vmatpush3.bf16.msra.mxu0 %v1604_v14  ;;  %v2784_v26 = vpop.xlane.xlu0 %392  ;;  %v1638_v6 = vpack.c.bf16 %v519_v27, %v518_v23  ;;  %v2786_v15 = vpop.xlane.xlu1 %426  ;;  %v1228_v29 = vmul.f32 %v1196_v48, %v519_v27  ;;  %v3339_v14 = vld [vmem:[#allocation90_spill] sm:$0xff]  ;;  %v1211_v56 = vmul.f32 %v1179_v2, %v502_v9  ;;  %v1181_v33 = vsub.f32 %v3347_v13, %v3346_v31 }
 0x1a0   :  { %3335 = vst [vmem:[#allocation16_spill] sm:$0xff] %v2784_v26  ;;  %3336 = vst [vmem:[#allocation79_spill] sm:$0xff] %v2786_v15  ;;  %v1775_v43 = vpop.eup %1774  ;;  %1784 = vrcp.f32 %v2784_v26  ;;  %v1197_v50 = vsub.f32 %v3340_v53, %v3339_v14  ;;  %v1182_v2 = vsub.f32 %v3349_v7, %v3348_v11 }
 0x1a1   :  { %1639 = vmatprep.subr.bf16.mxu1 %v1638_v6  ;;  %v1606_v22 = vpack.c.bf16 %v1228_v29, %v1227_v4  ;;  %v503_v44 = vmul.f32 %v1775_v43, %v3338_v34  ;;  %1786 = vrcp.f32 %v2786_v15  ;;  %v3344_v4 = vld [vmem:[#allocation70_spill] sm:$0xff] }
 0x1a2   :  { %v1777_v48 = vpop.eup %1776  ;;  %v520_v29 = vmul.f32 %v1773_v20, %v3344_v4 }
 0x1a3   :  { %1607 = vmatprep.subr.bf16.mxu0 %v1606_v22  ;;  %v1640_v52 = vpack.c.bf16 %v503_v44, %v502_v9  ;;  %v2797_v23 = vpop.xlane.xlu1 %394  ;;  %v2799_v27 = vpop.xlane.xlu0 %524  ;;  %v1212_v6 = vmul.f32 %v1180_v30, %v503_v44 }
 0x1a4   :  { %3343 = vst [vmem:[#allocation17_spill] sm:$0xff] %v2797_v23  ;;  %v1779_v43 = vpop.eup %1778  ;;  %1788 = vrcp.f32 %v2797_v23  ;;  %v588_v34 = vsub.f32 %v2527_v37, %v2799_v27  ;;  %v1229_v44 = vmul.f32 %v1197_v50, %v520_v29  ;;  %v3350_v37 = vld [vmem:[#allocation72_spill] sm:$0xff] }
 0x1a5   :  { %1641 = vmatpush3.bf16.msra.mxu1 %v1640_v52  ;;  %v1608_v53 = vpack.c.bf16 %v1212_v6, %v1211_v56  ;;  %v521_v15 = vmul.f32 %v1779_v43, %v3345_v21  ;;  %v504_v52 = vmul.f32 %v1777_v48, %v3350_v37  ;;  %v3351_v43 = vld [vmem:[#allocation73_spill] sm:$0xff]  ;;  %v3355_v37 = vld [vmem:[#allocation27_spill] sm:$0xff] }
 0x1a6   :  { %v620_v22 = vmul.f32 1.442695, %v588_v34  ;;  %v1781_v56 = vpop.eup %1780 }
 0x1a7   :  { %1609 = vmatpush3.bf16.msra.mxu0 %v1608_v53  ;;  %v1642_v30 = vpack.c.bf16 %v521_v15, %v520_v29  ;;  %v2810_v20 = vpop.xlane.xlu1 %526  ;;  %v2812_v9 = vpop.xlane.xlu0 %528  ;;  %v1230_v4 = vmul.f32 %v1198_v41, %v521_v15  ;;  %v505_v34 = vmul.f32 %v1781_v56, %v3351_v43  ;;  %v1213_v41 = vmul.f32 %v1181_v33, %v504_v52  ;;  %v3358_v43 = vld [vmem:[#allocation84_spill] sm:$0xff] }
 0x1a8   :  { %1790 = vpow2.f32 %v620_v22  ;;  %v589_v6 = vsub.f32 %v2533_v62, %v2810_v20  ;;  %v590_v13 = vsub.f32 %v2535_v55, %v2812_v9  ;;  %v1783_v53 = vpop.eup %1782  ;;  %v3352_v22 = vld [vmem:[#allocation92_spill] sm:$0xff] }
 0x1a9   :  { %1643 = vmatprep.subr.bf16.mxu1 %v1642_v30  ;;  %v1610_v7 = vpack.c.bf16 %v1230_v4, %v1229_v44  ;;  %v1644_v15 = vpack.c.bf16 %v505_v34, %v504_v52  ;;  %v1214_v48 = vmul.f32 %v1182_v2, %v505_v34  ;;  %v3353_v30 = vld [vmem:[#allocation26_spill] sm:$0xff]  ;;  %v3354_v4 = vld [vmem:[#allocation93_spill] sm:$0xff]  ;;  %v3357_v2 = vld [vmem:[#allocation75_spill] sm:$0xff] }
 0x1aa   :  { %v622_v21 = vmul.f32 1.442695, %v589_v6  ;;  %v1785_v5 = vpop.eup %1784  ;;  %v624_v25 = vmul.f32 1.442695, %v590_v13  ;;  %v1199_v44 = vsub.f32 %v3353_v30, %v3352_v22  ;;  %v1200_v56 = vsub.f32 %v3355_v37, %v3354_v4  ;;  %v3359_v34 = vld [vmem:[#allocation28_spill] sm:$0xff] }
 0x1ab   :  { %1611 = vmatprep.subr.bf16.mxu0 %v1610_v7  ;;  %v2820_v50 = vpop.xlane.xlu1 %530  ;;  %v1787_v29 = vpop.eup %1786  ;;  %1645 = vmatpush3.bf16.msra.mxu1 %v1644_v15  ;;  %v1612_v55 = vpack.c.bf16 %v1214_v48, %v1213_v41  ;;  %v3356_v7 = vld [vmem:[#allocation74_spill] sm:$0xff]  ;;  %v3362_v30 = vld [vmem:[#allocation76_spill] sm:$0xff] }
 0x1ac   :  { %1792 = vpow2.f32 %v622_v21  ;;  %v591_v62 = vsub.f32 %v2539_v36, %v2820_v50  ;;  %v2828_v13 = vpop.xlane.xlu0 %532  ;;  %v522_v33 = vmul.f32 %v1783_v53, %v3356_v7  ;;  %v523_v52 = vmul.f32 %v1787_v29, %v3357_v2  ;;  %v3360_v36 = vld [vmem:[#allocation85_spill] sm:$0xff] }
 0x1ad   :  { %1794 = vpow2.f32 %v624_v25  ;;  %v1183_v21 = vsub.f32 %v3359_v34, %v3358_v43  ;;  %v3361_v25 = vld [vmem:[#allocation29_spill] sm:$0xff]  ;;  %v592_v48 = vsub.f32 %v2541_v17, %v2828_v13  ;;  %1613 = vmatpush3.bf16.msra.mxu0 %v1612_v55  ;;  %v506_v37 = vmul.f32 %v1785_v5, %v3362_v30 }
 0x1ae   :  { %v1789_v6 = vpop.eup %1788  ;;  %v1184_v15 = vsub.f32 %v3361_v25, %v3360_v36  ;;  %v626_v41 = vmul.f32 1.442695, %v591_v62  ;;  %v1646_v26 = vpack.c.bf16 %v523_v52, %v522_v33  ;;  %v1231_v29 = vmul.f32 %v1199_v44, %v522_v33 }
 0x1af   :  { %v507_v23 = vmul.f32 %v1789_v6, %v3363_v61  ;;  %v2840_v53 = vpop.xlane.xlu1 %534  ;;  %v1232_v7 = vmul.f32 %v1200_v56, %v523_v52  ;;  %v628_v25 = vmul.f32 1.442695, %v592_v48  ;;  %v1215_v17 = vmul.f32 %v1183_v21, %v506_v37  ;;  %v2844_v61 = vld [vmem:[#allocation6 + $0x1] ss:$0 sm:$0xff] }
 0x1b0   :  { %1647 = vmatprep.subr.bf16.mxu1 %v1646_v26  ;;  %1796 = vpow2.f32 %v626_v41  ;;  %v593_v62 = vsub.f32 %v2545_v1, %v2840_v53  ;;  %v2846_v26 = vpop.xlane.xlu0 %536  ;;  %v3364_v33 = vmov 1.0  }
 0x1b1   :  { %v1648_v2 = vpack.c.bf16 %v507_v23, %v506_v37  ;;  %v1216_v34 = vmul.f32 %v1184_v15, %v507_v23  ;;  %v1614_v55 = vpack.c.bf16 %v1232_v7, %v1231_v29  ;;  %1798 = vpow2.f32 %v628_v25 }
 0x1b2   :  { %v1791_v0 = vpop.eup %1790  ;;  %v630_v56 = vmul.f32 1.442695, %v593_v62  ;;  %v594_v23 = vsub.f32 %v2547_v63, %v2846_v26 }
 0x1b3   :  { %684 = vadd.xlane.f32.xlu0 %v1791_v0  ;;  %1649 = vmatpush3.bf16.msra.mxu1 %v1648_v2  ;;  %v1616_v5 = vpack.c.bf16 %v1216_v34, %v1215_v17  ;;  %v752_v1 = vmul.f32 %v1791_v0, %v2844_v61  ;;  %v2853_v21 = vpop.xlane.xlu1 %538 }
 0x1b4   :  { %1615 = vmatprep.subr.bf16.mxu0 %v1614_v55  ;;  %1800 = vpow2.f32 %v630_v56  ;;  %v632_v15 = vmul.f32 1.442695, %v594_v23  ;;  %v595_v41 = vsub.f32 %v2551_v8, %v2853_v21  ;;  %v2859_v30 = vpop.xlane.xlu0 %540 }
 0x1b5   :  { %1617 = vmatpush3.bf16.msra.mxu0 %v1616_v5  ;;  %v596_v37 = vsub.f32 %v3316_v35, %v2859_v30 }
 0x1b6   :  { %v1793_v6 = vpop.eup %1792  ;;  %1371 = vmatmul.mubr.f32.vlgmr.msra.gmra.mrb[0].mxu1 %v3364_v33  ;;  %1802 = vpow2.f32 %v632_v15  ;;  %v634_v0 = vmul.f32 1.442695, %v595_v41 }
 0x1b7   :  { %v1795_v44 = vpop.eup %1794  ;;  %686 = vadd.xlane.f32.xlu1 %v1793_v6  ;;  %v753_v52 = vmul.f32 %v1793_v6, %v2844_v61  ;;  %v2864_v2 = vpop.xlane.xlu1 %542  ;;  %v636_v8 = vmul.f32 1.442695, %v596_v37 }
 0x1b8   :  { %688 = vadd.xlane.f32.xlu0 %v1795_v44  ;;  %1298 = vmatmul.mubr.f32.vlgmr.msra.gmra.mrb[0].mxu0 %v3364_v33  ;;  %v754_v63 = vmul.f32 %v1795_v44, %v2844_v61  ;;  %1804 = vpow2.f32 %v634_v0  ;;  %v597_v34 = vsub.f32 %v3318_v16, %v2864_v2  ;;  %v2869_v17 = vpop.xlane.xlu0 %544 }
 0x1b9   :  { %1806 = vpow2.f32 %v636_v8  ;;  %v598_v55 = vsub.f32 %v3331_v45, %v2869_v17 }
 0x1ba   :  { %v1797_v48 = vpop.eup %1796  ;;  %v638_v35 = vmul.f32 1.442695, %v597_v34 }
 0x1bb   :  { %784 = vadd.xlane.f32.xlu1 %v752_v1  ;;  %v755_v29 = vmul.f32 %v1797_v48, %v2844_v61  ;;  %v1799_v7 = vpop.eup %1798  ;;  %v2874_v44 = vpop.xlane.xlu1 %546  ;;  %v640_v16 = vmul.f32 1.442695, %v598_v55 }
 0x1bc   :  { %786 = vadd.xlane.f32.xlu0 %v753_v52  ;;  %v756_v25 = vmul.f32 %v1799_v7, %v2844_v61  ;;  %1808 = vpow2.f32 %v638_v35  ;;  %v599_v56 = vsub.f32 %v3333_v57, %v2874_v44  ;;  %v2879_v1 = vpop.xlane.xlu0 %548 }
 0x1bd   :  { %1810 = vpow2.f32 %v640_v16  ;;  %v600_v52 = vsub.f32 %v3346_v31, %v2879_v1 }
 0x1be   :  { %v1801_v62 = vpop.eup %1800  ;;  %v642_v45 = vmul.f32 1.442695, %v599_v56 }
 0x1bf   :  { %690 = vadd.xlane.f32.xlu1 %v1797_v48  ;;  %v757_v5 = vmul.f32 %v1801_v62, %v2844_v61  ;;  %v644_v57 = vmul.f32 1.442695, %v600_v52 }
 0x1c0   :  { %788 = vadd.xlane.f32.xlu0 %v754_v63  ;;  %v1803_v6 = vpop.eup %1802  ;;  %v2884_v63 = vpop.xlane.xlu1 %550  ;;  %1812 = vpow2.f32 %v642_v45  ;;  %v3366_v45 = vld [vmem:[#allocation87_spill] sm:$0xff] }
 0x1c1   :  { %v758_v23 = vmul.f32 %v1803_v6, %v2844_v61  ;;  %v601_v48 = vsub.f32 %v3348_v11, %v2884_v63  ;;  %1814 = vpow2.f32 %v644_v57 }
 0x1c2   :  { %v1805_v33 = vpop.eup %1804 }
 0x1c3   :  { %692 = vadd.xlane.f32.xlu1 %v1799_v7  ;;  %v759_v15 = vmul.f32 %v1805_v33, %v2844_v61  ;;  %v1807_v41 = vpop.eup %1806  ;;  %v646_v31 = vmul.f32 1.442695, %v601_v48 }
 0x1c4   :  { %790 = vadd.xlane.f32.xlu0 %v755_v29  ;;  %v760_v0 = vmul.f32 %v1807_v41, %v2844_v61  ;;  %v2889_v29 = vpop.xlane.xlu0 %552 }
 0x1c5   :  { %v602_v7 = vsub.f32 %v3358_v43, %v2889_v29  ;;  %1816 = vpow2.f32 %v646_v31 }
 0x1c6   :  { %v1809_v37 = vpop.eup %1808 }
 0x1c7   :  { %694 = vadd.xlane.f32.xlu1 %v1801_v62  ;;  %v761_v8 = vmul.f32 %v1809_v37, %v2844_v61  ;;  %v1811_v34 = vpop.eup %1810  ;;  %v648_v11 = vmul.f32 1.442695, %v602_v7 }
 0x1c8   :  { %792 = vadd.xlane.f32.xlu0 %v756_v25  ;;  %v2894_v25 = vpop.xlane.xlu1 %554  ;;  %v762_v35 = vmul.f32 %v1811_v34, %v2844_v61 }
 0x1c9   :  { %v603_v62 = vsub.f32 %v3360_v36, %v2894_v25  ;;  %1818 = vpow2.f32 %v648_v11 }
 0x1ca   :  { %v1813_v55 = vpop.eup %1812 }
 0x1cb   :  { %696 = vadd.xlane.f32.xlu1 %v1803_v6  ;;  %v650_v43 = vmul.f32 1.442695, %v603_v62  ;;  %v3365_v6 = vld [vmem:[#allocation86_spill] sm:$0xff]  ;;  %v763_v56 = vmul.f32 %v1813_v55, %v2844_v61 }
 0x1cc   :  { %794 = vadd.xlane.f32.xlu0 %v757_v5  ;;  %v2899_v5 = vpop.xlane.xlu0 %556 }
 0x1cd   :  { %v604_v16 = vsub.f32 %v3365_v6, %v2899_v5  ;;  %1820 = vpow2.f32 %v650_v43 }
 0x1cf   :  { %698 = vadd.xlane.f32.xlu1 %v1805_v33  ;;  %v2904_v33 = vpop.xlane.xlu1 %558  ;;  %v652_v36 = vmul.f32 1.442695, %v604_v16 }
 0x1d0   :  { %796 = vadd.xlane.f32.xlu0 %v758_v23  ;;  %v1815_v23 = vpop.eup %1814  ;;  %v605_v52 = vsub.f32 %v3366_v45, %v2904_v33  ;;  %v2909_v57 = vpop.xlane.xlu0 %560 }
 0x1d1   :  { %1822 = vpow2.f32 %v652_v36 }
 0x1d2   :  { %v654_v48 = vmul.f32 1.442695, %v605_v52 }
 0x1d3   :  { %700 = vadd.xlane.f32.xlu1 %v1807_v41  ;;  %v1817_v41 = vpop.eup %1816  ;;  %v2914_v7 = vpop.xlane.xlu1 %562 }
 0x1d4   :  { %798 = vadd.xlane.f32.xlu0 %v759_v15  ;;  %v764_v15 = vmul.f32 %v1815_v23, %v2844_v61  ;;  %v1819_v31 = vpop.eup %1818  ;;  %1824 = vpow2.f32 %v654_v48 }
 0x1d5   :  { %v766_v11 = vmul.f32 %v1819_v31, %v2844_v61 }
 0x1d7   :  { %702 = vadd.xlane.f32.xlu1 %v1809_v37  ;;  %v765_v37 = vmul.f32 %v1817_v41, %v2844_v61  ;;  %v1821_v62 = vpop.eup %1820  ;;  %v2924_v16 = vpop.xlane.xlu1 %566 }
 0x1d8   :  { %800 = vadd.xlane.f32.xlu0 %v760_v0  ;;  %v606_v0 = vsub.f32 %v2583_v47, %v2909_v57  ;;  %v767_v43 = vmul.f32 %v1821_v62, %v2844_v61 }
 0x1db   :  { %704 = vadd.xlane.f32.xlu1 %v1811_v34  ;;  %v607_v34 = vsub.f32 %v2587_v46, %v2914_v7  ;;  %v1823_v6 = vpop.eup %1822  ;;  %v2934_v48 = vpop.xlane.xlu1 %570 }
 0x1dc   :  { %802 = vadd.xlane.f32.xlu0 %v761_v8  ;;  %v656_v8 = vmul.f32 1.442695, %v606_v0  ;;  %v611_v0 = vsub.f32 %v2601_v40, %v2934_v48 }
 0x1dd   :  { %v658_v47 = vmul.f32 1.442695, %v607_v34 }
 0x1de   :  { %1826 = vpow2.f32 %v656_v8  ;;  %v1825_v36 = vpop.eup %1824 }
 0x1df   :  { %706 = vadd.xlane.f32.xlu1 %v1813_v55  ;;  %1828 = vpow2.f32 %v658_v47  ;;  %v2944_v47 = vpop.xlane.xlu1 %574 }
 0x1e0   :  { %804 = vadd.xlane.f32.xlu0 %v762_v35  ;;  %v2919_v35 = vpop.xlane.xlu0 %564 }
 0x1e1   :  { %v608_v55 = vsub.f32 %v2589_v12, %v2919_v35 }
 0x1e3   :  { %708 = vadd.xlane.f32.xlu1 %v1815_v23  ;;  %v660_v46 = vmul.f32 1.442695, %v608_v55  ;;  %v768_v23 = vmul.f32 %v1823_v6, %v2844_v61  ;;  %v613_v55 = vsub.f32 %v2607_v51, %v2944_v47 }
 0x1e4   :  { %806 = vadd.xlane.f32.xlu0 %v763_v56  ;;  %v609_v56 = vsub.f32 %v2595_v49, %v2924_v16  ;;  %v2929_v45 = vpop.xlane.xlu0 %568 }
 0x1e5   :  { %1830 = vpow2.f32 %v660_v46  ;;  %v610_v52 = vsub.f32 %v2597_v54, %v2929_v45  ;;  %v666_v54 = vmul.f32 1.442695, %v611_v0 }
 0x1e6   :  { %v662_v12 = vmul.f32 1.442695, %v609_v56 }
 0x1e7   :  { %710 = vadd.xlane.f32.xlu1 %v1817_v41  ;;  %v664_v49 = vmul.f32 1.442695, %v610_v52 }
 0x1e8   :  { %808 = vadd.xlane.f32.xlu0 %v764_v15  ;;  %v769_v15 = vmul.f32 %v1825_v36, %v2844_v61  ;;  %v1827_v41 = vpop.eup %1826  ;;  %1832 = vpow2.f32 %v662_v12  ;;  %v2939_v8 = vpop.xlane.xlu0 %572 }
 0x1e9   :  { %1834 = vpow2.f32 %v664_v49  ;;  %v612_v34 = vsub.f32 %v2603_v42, %v2939_v8  ;;  %v670_v42 = vmul.f32 1.442695, %v613_v55  ;;  %v2954_v12 = vpop.xlane.xlu1 %578 }
 0x1ea   :  { %1836 = vpow2.f32 %v666_v54  ;;  %v615_v52 = vsub.f32 %v3325_v3, %v2954_v12 }
 0x1eb   :  { %712 = vadd.xlane.f32.xlu1 %v1819_v31  ;;  %v1829_v31 = vpop.eup %1828  ;;  %v668_v40 = vmul.f32 1.442695, %v612_v34 }
 0x1ec   :  { %810 = vadd.xlane.f32.xlu0 %v765_v37  ;;  %v770_v37 = vmul.f32 %v1827_v41, %v2844_v61  ;;  %v2949_v46 = vpop.xlane.xlu0 %576 }
 0x1ed   :  { %1838 = vpow2.f32 %v668_v40  ;;  %v614_v56 = vsub.f32 %v3323_v19, %v2949_v46  ;;  %v674_v19 = vmul.f32 1.442695, %v615_v52  ;;  %v2964_v54 = vpop.xlane.xlu1 %582 }
 0x1ee   :  { %1840 = vpow2.f32 %v670_v42  ;;  %v617_v34 = vsub.f32 %v3341_v18, %v2964_v54 }
 0x1ef   :  { %714 = vadd.xlane.f32.xlu1 %v1821_v62  ;;  %v1831_v62 = vpop.eup %1830  ;;  %v672_v51 = vmul.f32 1.442695, %v614_v56 }
 0x1f0   :  { %812 = vadd.xlane.f32.xlu0 %v766_v11  ;;  %v771_v11 = vmul.f32 %v1829_v31, %v2844_v61  ;;  %v2959_v49 = vpop.xlane.xlu0 %580  ;;  %v678_v55 = vmul.f32 1.442695, %v617_v34 }
 0x1f1   :  { %1842 = vpow2.f32 %v672_v51  ;;  %v616_v0 = vsub.f32 %v3339_v14, %v2959_v49  ;;  %v2974_v56 = vpop.xlane.xlu1 %586 }
 0x1f2   :  { %1844 = vpow2.f32 %v674_v19  ;;  %v619_v18 = vsub.f32 %v3354_v4, %v2974_v56 }
 0x1f3   :  { %716 = vadd.xlane.f32.xlu1 %v1823_v6  ;;  %v1833_v6 = vpop.eup %1832  ;;  %v676_v3 = vmul.f32 1.442695, %v616_v0 }
 0x1f4   :  { %814 = vadd.xlane.f32.xlu0 %v767_v43  ;;  %v772_v43 = vmul.f32 %v1831_v62, %v2844_v61  ;;  %v2969_v40 = vpop.xlane.xlu0 %584  ;;  %v682_v51 = vmul.f32 1.442695, %v619_v18 }
 0x1f5   :  { %v618_v14 = vsub.f32 %v3352_v22, %v2969_v40  ;;  %1846 = vpow2.f32 %v676_v3  ;;  %v2146_v22 = vmov 0.0  }
 0x1f6   :  { %1848 = vpow2.f32 %v678_v55  ;;  %73 = vst.msk [vmem:[#allocation4] sm:$0x1] %vm72_vm0, %v2146_v22  ;;  %74 = vst.msk [vmem:[#allocation5] sm:$0x1] %vm72_vm0, %v2146_v22 }
 0x1f7   :  { %718 = vadd.xlane.f32.xlu1 %v1825_v36  ;;  %v1835_v36 = vpop.eup %1834  ;;  %v680_v42 = vmul.f32 1.442695, %v618_v14  ;;  %v3369_v14 = vld [vmem:[#allocation99_spill] sm:$0xff] }
 0x1f8   :  { %816 = vadd.xlane.f32.xlu0 %v768_v23  ;;  %v773_v23 = vmul.f32 %v1833_v6, %v2844_v61 }
 0x1f9   :  { %1850 = vpow2.f32 %v680_v42 }
 0x1fa   :  { %1852 = vpow2.f32 %v682_v51 }
 0x1fb   :  { %720 = vadd.xlane.f32.xlu1 %v1827_v41  ;;  %v1837_v41 = vpop.eup %1836 }
 0x1fc   :  { %818 = vadd.xlane.f32.xlu0 %v769_v15  ;;  %v774_v15 = vmul.f32 %v1835_v36, %v2844_v61 }
 0x1ff   :  { %722 = vadd.xlane.f32.xlu1 %v1829_v31  ;;  %v1839_v31 = vpop.eup %1838 }
 0x200   :  { %820 = vadd.xlane.f32.xlu0 %v770_v37  ;;  %v775_v37 = vmul.f32 %v1837_v41, %v2844_v61 }
 0x203   :  { %724 = vadd.xlane.f32.xlu1 %v1831_v62  ;;  %v1841_v62 = vpop.eup %1840 }
 0x204   :  { %822 = vadd.xlane.f32.xlu0 %v771_v11  ;;  %v776_v11 = vmul.f32 %v1839_v31, %v2844_v61 }
 0x207   :  { %726 = vadd.xlane.f32.xlu1 %v1833_v6  ;;  %v1843_v6 = vpop.eup %1842 }
 0x208   :  { %824 = vadd.xlane.f32.xlu0 %v772_v43  ;;  %v777_v43 = vmul.f32 %v1841_v62, %v2844_v61 }
 0x20b   :  { %728 = vadd.xlane.f32.xlu1 %v1835_v36  ;;  %v1845_v36 = vpop.eup %1844 }
 0x20c   :  { %826 = vadd.xlane.f32.xlu0 %v773_v23  ;;  %v778_v23 = vmul.f32 %v1843_v6, %v2844_v61  ;;  %v779_v52 = vmul.f32 %v1845_v36, %v2844_v61 }
 0x20f   :  { %730 = vadd.xlane.f32.xlu1 %v1837_v41 }
 0x210   :  { %828 = vadd.xlane.f32.xlu0 %v774_v15  ;;  %v1847_v15 = vpop.eup %1846 }
 0x211   :  { %v780_v4 = vmul.f32 %v1847_v15, %v2844_v61  ;;  %v1849_v41 = vpop.eup %1848 }
 0x212   :  { %v781_v19 = vmul.f32 %v1849_v41, %v2844_v61  ;;  %v1851_v0 = vpop.eup %1850 }
 0x213   :  { %732 = vadd.xlane.f32.xlu1 %v1839_v31  ;;  %v1853_v31 = vpop.eup %1852 }
 0x214   :  { %830 = vadd.xlane.f32.xlu0 %v775_v37  ;;  %v782_v37 = vmul.f32 %v1851_v0, %v2844_v61  ;;  %v783_v3 = vmul.f32 %v1853_v31, %v2844_v61  ;;  %v3370_v61 = vld [vmem:[#allocation102_spill] sm:$0xff] }
 0x217   :  { %734 = vadd.xlane.f32.xlu1 %v1841_v62  ;;  %v3368_v62 = vld [vmem:[#allocation98_spill] sm:$0xff] }
 0x218   :  { %832 = vadd.xlane.f32.xlu0 %v776_v11  ;;  %v3367_v11 = vld [vmem:[#allocation95_spill] sm:$0xff] }
 0x21b   :  { %736 = vadd.xlane.f32.xlu1 %v1843_v6 }
 0x21c   :  { %834 = vadd.xlane.f32.xlu0 %v777_v43 }
 0x21f   :  { %738 = vadd.xlane.f32.xlu1 %v1845_v36 }
 0x220   :  { %836 = vadd.xlane.f32.xlu0 %v778_v23 }
 0x223   :  { %740 = vadd.xlane.f32.xlu1 %v1847_v15 }
 0x224   :  { %838 = vadd.xlane.f32.xlu0 %v779_v52 }
 0x227   :  { %742 = vadd.xlane.f32.xlu1 %v1849_v41 }
 0x228   :  { %840 = vadd.xlane.f32.xlu0 %v780_v4 }
 0x22b   :  { %744 = vadd.xlane.f32.xlu1 %v1851_v0 }
 0x22c   :  { %842 = vadd.xlane.f32.xlu0 %v781_v19 }
 0x22f   :  { %746 = vadd.xlane.f32.xlu1 %v1853_v31 }
 0x230   :  { %844 = vadd.xlane.f32.xlu0 %v782_v37 }
 0x233   :  { %846 = vadd.xlane.f32.xlu1 %v783_v3 }
 0x240   :  { %v685_v34 = vpop.xlane.xlu0 %684 }
 0x241   :  { %1854 = vlog2.f32 %v685_v34 }
 0x242   :  { %1856 = vlog2.f32 %v3367_v11 }
 0x243   :  { %1858 = vlog2.f32 %v3368_v62 }
 0x244   :  { %1860 = vlog2.f32 %v3369_v14  ;;  %v687_v55 = vpop.xlane.xlu1 %686  ;;  %v3371_v14 = vld [vmem:[#allocation31_spill] sm:$0xff] }
 0x245   :  { %v689_v43 = vpop.xlane.xlu0 %688  ;;  %1862 = vlog2.f32 %v687_v55  ;;  %v912_v55 = vsub.f32 %v2799_v27, %v3371_v14 }
 0x246   :  { %1864 = vlog2.f32 %v689_v43  ;;  %v3372_v43 = vld [vmem:[#allocation33_spill] sm:$0xff] }
 0x248   :  { %v785_v6 = vpop.xlane.xlu1 %784 }
 0x249   :  { %v787_v42 = vpop.xlane.xlu0 %786  ;;  %1866 = vlog2.f32 %v785_v6  ;;  %v913_v6 = vsub.f32 %v2810_v20, %v3372_v43 }
 0x24a   :  { %1868 = vlog2.f32 %v787_v42 }
 0x24b   :  { %v1855_v18 = vpop.eup %1854  ;;  %1870 = vlog2.f32 %v3370_v61  ;;  %v3373_v61 = vld [vmem:[#allocation36_spill] sm:$0xff] }
 0x24c   :  { %v1857_v23 = vpop.eup %1856  ;;  %v849_v22 = vmul.f32 0.6931472, %v1855_v18  ;;  %v691_v36 = vpop.xlane.xlu1 %690 }
 0x24d   :  { %v789_v51 = vpop.xlane.xlu0 %788  ;;  %v1859_v52 = vpop.eup %1858  ;;  %1872 = vlog2.f32 %v691_v36  ;;  %v945_v4 = vmul.f32 0.6931472, %v1857_v23  ;;  %v914_v36 = vsub.f32 %v2812_v9, %v3373_v61 }
 0x24e   :  { %v1861_v15 = vpop.eup %1860  ;;  %1874 = vlog2.f32 %v789_v51  ;;  %v947_v0 = vmul.f32 0.6931472, %v1859_v52 }
 0x24f   :  { %v1863_v41 = vpop.eup %1862  ;;  %1876 = vlog2.f32 %v2665_v39  ;;  %v1008_v37 = vsub.f32 %v849_v22, %v945_v4  ;;  %v949_v11 = vmul.f32 0.6931472, %v1861_v15 }
 0x250   :  { %v1865_v19 = vpop.eup %1864  ;;  %v851_v31 = vmul.f32 0.6931472, %v1863_v41  ;;  %v693_v3 = vpop.xlane.xlu1 %692 }
 0x251   :  { %v791_v34 = vpop.xlane.xlu0 %790  ;;  %v853_v62 = vmul.f32 0.6931472, %v1865_v19  ;;  %1878 = vlog2.f32 %v693_v3  ;;  %v1040_v51 = vadd.f32 %v1008_v37, %v912_v55 }
 0x252   :  { %v1009_v42 = vsub.f32 %v851_v31, %v947_v0  ;;  %1880 = vlog2.f32 %v791_v34 }
 0x253   :  { %v1867_v18 = vpop.eup %1866  ;;  %1882 = vlog2.f32 %v2679_v24  ;;  %v1010_v39 = vsub.f32 %v853_v62, %v949_v11 }
 0x254   :  { %v1869_v23 = vpop.eup %1868  ;;  %v1041_v52 = vadd.f32 %v1009_v42, %v913_v6  ;;  %v1073_v15 = vmul.f32 0.6931472, %v1867_v18  ;;  %v695_v4 = vpop.xlane.xlu1 %694 }
 0x255   :  { %v793_v41 = vpop.xlane.xlu0 %792  ;;  %v1871_v19 = vpop.eup %1870  ;;  %v1075_v27 = vmul.f32 0.6931472, %v1869_v23  ;;  %1884 = vlog2.f32 %v695_v4  ;;  %v1042_v20 = vadd.f32 %v1010_v39, %v914_v36  ;;  %v3374_v23 = vld [vmem:[#allocation37_spill] sm:$0xff] }
 0x256   :  { %v1379_v3 = vadd.f32 %v1041_v52, %v1040_v51  ;;  %v1136_v0 = vsub.f32 %v1073_v15, %v849_v22  ;;  %1886 = vlog2.f32 %v793_v41  ;;  %v951_v14 = vmul.f32 0.6931472, %v1871_v19 }
 0x257   :  { %v1873_v34 = vpop.eup %1872  ;;  %1888 = vlog2.f32 %v2689_v32  ;;  %v1137_v24 = vsub.f32 %v1075_v27, %v851_v31  ;;  %v915_v61 = vsub.f32 %v2820_v50, %v3374_v23  ;;  %v3376_v23 = vld [vmem:[#allocation41_spill] sm:$0xff] }
 0x258   :  { %v1875_v11 = vpop.eup %1874  ;;  %v1380_v43 = vadd.f32 %v1379_v3, %v1042_v20  ;;  %v855_v9 = vmul.f32 0.6931472, %v1873_v34  ;;  %v697_v37 = vpop.xlane.xlu1 %696  ;;  %v3375_v3 = vld [vmem:[#allocation40_spill] sm:$0xff] }
 0x259   :  { %v795_v55 = vpop.xlane.xlu0 %794  ;;  %v1877_v6 = vpop.eup %1876  ;;  %v1420_v42 = vadd.f32 %v1137_v24, %v1136_v0  ;;  %v1077_v18 = vmul.f32 0.6931472, %v1875_v11  ;;  %1890 = vlog2.f32 %v697_v37  ;;  %v916_v20 = vsub.f32 %v2828_v13, %v3375_v3 }
 0x25a   :  { %v1011_v39 = vsub.f32 %v855_v9, %v951_v14  ;;  %1892 = vlog2.f32 %v795_v55  ;;  %v953_v36 = vmul.f32 0.6931472, %v1877_v6  ;;  %v917_v13 = vsub.f32 %v2840_v53, %v3376_v23 }
 0x25b   :  { %v1879_v22 = vpop.eup %1878  ;;  %1894 = vlog2.f32 %v2703_v59  ;;  %v1138_v32 = vsub.f32 %v1077_v18, %v853_v62 }
 0x25c   :  { %v1881_v31 = vpop.eup %1880  ;;  %v1043_v51 = vadd.f32 %v1011_v39, %v915_v61  ;;  %v857_v52 = vmul.f32 0.6931472, %v1879_v22  ;;  %v699_v15 = vpop.xlane.xlu1 %698 }
 0x25d   :  { %v797_v4 = vpop.xlane.xlu0 %796  ;;  %v1883_v41 = vpop.eup %1882  ;;  %v1421_v19 = vadd.f32 %v1420_v42, %v1138_v32  ;;  %v1079_v27 = vmul.f32 0.6931472, %v1881_v31  ;;  %1896 = vlog2.f32 %v699_v15 }
 0x25e   :  { %v1381_v50 = vadd.f32 %v1380_v43, %v1043_v51  ;;  %v1012_v0 = vsub.f32 %v857_v52, %v953_v36  ;;  %1898 = vlog2.f32 %v797_v4  ;;  %v955_v24 = vmul.f32 0.6931472, %v1883_v41 }
 0x25f   :  { %v1885_v34 = vpop.eup %1884  ;;  %1900 = vlog2.f32 %v2713_v10  ;;  %v1139_v59 = vsub.f32 %v1079_v27, %v855_v9 }
 0x260   :  { %v1887_v62 = vpop.eup %1886  ;;  %v1044_v11 = vadd.f32 %v1012_v0, %v916_v20  ;;  %v859_v14 = vmul.f32 0.6931472, %v1885_v34  ;;  %v701_v37 = vpop.xlane.xlu1 %700 }
 0x261   :  { %v799_v55 = vpop.xlane.xlu0 %798  ;;  %v1889_v6 = vpop.eup %1888  ;;  %v1422_v42 = vadd.f32 %v1421_v19, %v1139_v59  ;;  %v1081_v18 = vmul.f32 0.6931472, %v1887_v62  ;;  %1902 = vlog2.f32 %v701_v37  ;;  %v3377_v19 = vld [vmem:[#allocation44_spill] sm:$0xff] }
 0x262   :  { %v1382_v43 = vadd.f32 %v1381_v50, %v1044_v11  ;;  %v1013_v61 = vsub.f32 %v859_v14, %v955_v24  ;;  %1904 = vlog2.f32 %v799_v55  ;;  %v957_v22 = vmul.f32 0.6931472, %v1889_v6  ;;  %v3378_v55 = vld [vmem:[#allocation45_spill] sm:$0xff] }
 0x263   :  { %v1891_v39 = vpop.eup %1890  ;;  %1906 = vlog2.f32 %v2727_v60  ;;  %v1140_v10 = vsub.f32 %v1081_v18, %v857_v52  ;;  %v918_v53 = vsub.f32 %v2846_v26, %v3377_v19  ;;  %v919_v26 = vsub.f32 %v2853_v21, %v3378_v55 }
 0x264   :  { %v1893_v9 = vpop.eup %1892  ;;  %v1045_v32 = vadd.f32 %v1013_v61, %v917_v13  ;;  %v861_v31 = vmul.f32 0.6931472, %v1891_v39  ;;  %v703_v36 = vpop.xlane.xlu1 %702 }
 0x265   :  { %v801_v51 = vpop.xlane.xlu0 %800  ;;  %v1895_v15 = vpop.eup %1894  ;;  %v1423_v4 = vadd.f32 %v1422_v42, %v1140_v10  ;;  %v1083_v41 = vmul.f32 0.6931472, %v1893_v9  ;;  %1908 = vlog2.f32 %v703_v36 }
 0x266   :  { %v1383_v27 = vadd.f32 %v1382_v43, %v1045_v32  ;;  %v1014_v3 = vsub.f32 %v861_v31, %v957_v22  ;;  %1910 = vlog2.f32 %v801_v51  ;;  %v959_v50 = vmul.f32 0.6931472, %v1895_v15  ;;  %v3379_v32 = vld [vmem:[#allocation48_spill] sm:$0xff] }
 0x267   :  { %v1897_v20 = vpop.eup %1896  ;;  %1912 = vlog2.f32 %v2737_v38  ;;  %v1141_v60 = vsub.f32 %v1083_v41, %v859_v14  ;;  %v920_v21 = vsub.f32 %v2859_v30, %v3379_v32 }
 0x268   :  { %v1899_v52 = vpop.eup %1898  ;;  %v1046_v0 = vadd.f32 %v1014_v3, %v918_v53  ;;  %v863_v34 = vmul.f32 0.6931472, %v1897_v20  ;;  %v705_v59 = vpop.xlane.xlu1 %704 }
 0x269   :  { %v803_v62 = vpop.xlane.xlu0 %802  ;;  %v1901_v24 = vpop.eup %1900  ;;  %v1424_v11 = vadd.f32 %v1423_v4, %v1141_v60  ;;  %v1085_v37 = vmul.f32 0.6931472, %v1899_v52  ;;  %1914 = vlog2.f32 %v705_v59  ;;  %v3380_v52 = vld [vmem:[#allocation49_spill] sm:$0xff] }
 0x26a   :  { %v1384_v6 = vadd.f32 %v1383_v27, %v1046_v0  ;;  %v1015_v42 = vsub.f32 %v863_v34, %v959_v50  ;;  %1916 = vlog2.f32 %v803_v62  ;;  %v961_v23 = vmul.f32 0.6931472, %v1901_v24  ;;  %v3381_v62 = vld [vmem:[#allocation78_spill] sm:$0xff] }
 0x26b   :  { %v1903_v18 = vpop.eup %1902  ;;  %1918 = vlog2.f32 %v2751_v58  ;;  %v1142_v38 = vsub.f32 %v1085_v37, %v861_v31  ;;  %v921_v30 = vsub.f32 %v2864_v2, %v3380_v52 }
 0x26c   :  { %v1905_v14 = vpop.eup %1904  ;;  %v1047_v13 = vadd.f32 %v1015_v42, %v919_v26  ;;  %v865_v43 = vmul.f32 0.6931472, %v1903_v18  ;;  %v707_v61 = vpop.xlane.xlu1 %706 }
 0x26d   :  { %v805_v39 = vpop.xlane.xlu0 %804  ;;  %v1907_v10 = vpop.eup %1906  ;;  %v1425_v9 = vadd.f32 %v1424_v11, %v1142_v38  ;;  %v1087_v22 = vmul.f32 0.6931472, %v1905_v14  ;;  %1920 = vlog2.f32 %v707_v61  ;;  %v3382_v38 = vld [vmem:[#allocation52_spill] sm:$0xff] }
 0x26e   :  { %v1385_v36 = vadd.f32 %v1384_v6, %v1047_v13  ;;  %v1016_v51 = vsub.f32 %v865_v43, %v961_v23  ;;  %1922 = vlog2.f32 %v805_v39  ;;  %v963_v4 = vmul.f32 0.6931472, %v1907_v10  ;;  %v3383_v61 = vld [vmem:[#allocation16_spill] sm:$0xff] }
 0x26f   :  { %v1909_v15 = vpop.eup %1908  ;;  %1924 = vlog2.f32 %v2761_v28  ;;  %v1143_v58 = vsub.f32 %v1087_v22, %v863_v34  ;;  %v922_v2 = vsub.f32 %v2869_v17, %v3382_v38 }
 0x270   :  { %v1911_v31 = vpop.eup %1910  ;;  %v1048_v41 = vadd.f32 %v1016_v51, %v920_v21  ;;  %v867_v19 = vmul.f32 0.6931472, %v1909_v15  ;;  %v709_v53 = vpop.xlane.xlu1 %708 }
 0x271   :  { %v807_v27 = vpop.xlane.xlu0 %806  ;;  %v1913_v3 = vpop.eup %1912  ;;  %v1426_v20 = vadd.f32 %v1425_v9, %v1143_v58  ;;  %v1089_v60 = vmul.f32 0.6931472, %v1911_v31  ;;  %1926 = vlog2.f32 %v709_v53  ;;  %v3384_v58 = vld [vmem:[#allocation53_spill] sm:$0xff] }
 0x272   :  { %v1386_v50 = vadd.f32 %v1385_v36, %v1048_v41  ;;  %v1017_v0 = vsub.f32 %v867_v19, %v963_v4  ;;  %1928 = vlog2.f32 %v807_v27  ;;  %v965_v24 = vmul.f32 0.6931472, %v1913_v3  ;;  %v3385_v53 = vld [vmem:[#allocation17_spill] sm:$0xff] }
 0x273   :  { %v1915_v59 = vpop.eup %1914  ;;  %1930 = vlog2.f32 %v3381_v62  ;;  %v1144_v28 = vsub.f32 %v1089_v60, %v865_v43  ;;  %v923_v17 = vsub.f32 %v2874_v44, %v3384_v58  ;;  %v3386_v62 = vld [vmem:[#allocation59_spill] sm:$0xff] }
 0x274   :  { %v1917_v34 = vpop.eup %1916  ;;  %v1049_v11 = vadd.f32 %v1017_v0, %v921_v30  ;;  %v869_v37 = vmul.f32 0.6931472, %v1915_v59  ;;  %v711_v55 = vpop.xlane.xlu1 %710  ;;  %v924_v44 = vsub.f32 %v2879_v1, %v3386_v62 }
 0x275   :  { %v809_v26 = vpop.xlane.xlu0 %808  ;;  %v1919_v6 = vpop.eup %1918  ;;  %v1427_v42 = vadd.f32 %v1426_v20, %v1144_v28  ;;  %v1091_v18 = vmul.f32 0.6931472, %v1917_v34  ;;  %1932 = vlog2.f32 %v711_v55 }
 0x276   :  { %v1387_v14 = vadd.f32 %v1386_v50, %v1049_v11  ;;  %v1018_v23 = vsub.f32 %v869_v37, %v965_v24  ;;  %1934 = vlog2.f32 %v809_v26  ;;  %v967_v10 = vmul.f32 0.6931472, %v1919_v6  ;;  %v3387_v11 = vld [vmem:[#allocation94_spill] sm:$0xff] }
 0x277   :  { %v1921_v13 = vpop.eup %1920  ;;  %1936 = vlog2.f32 %v3383_v61  ;;  %v1145_v43 = vsub.f32 %v1091_v18, %v867_v19 }
 0x278   :  { %v1923_v39 = vpop.eup %1922  ;;  %v1050_v9 = vadd.f32 %v1018_v23, %v922_v2  ;;  %v871_v22 = vmul.f32 0.6931472, %v1921_v13  ;;  %v713_v32 = vpop.xlane.xlu1 %712  ;;  %v3388_v13 = vld [vmem:[#allocation60_spill] sm:$0xff] }
 0x279   :  { %v811_v21 = vpop.xlane.xlu0 %810  ;;  %v1925_v36 = vpop.eup %1924  ;;  %v1428_v51 = vadd.f32 %v1427_v42, %v1145_v43  ;;  %v1093_v15 = vmul.f32 0.6931472, %v1923_v39  ;;  %1938 = vlog2.f32 %v713_v32  ;;  %v925_v1 = vsub.f32 %v2884_v63, %v3388_v13 }
 0x27a   :  { %v1388_v31 = vadd.f32 %v1387_v14, %v1050_v9  ;;  %v1019_v4 = vsub.f32 %v871_v22, %v967_v10  ;;  %1940 = vlog2.f32 %v811_v21  ;;  %v969_v3 = vmul.f32 0.6931472, %v1925_v36  ;;  %v3389_v10 = vld [vmem:[#allocation96_spill] sm:$0xff] }
 0x27b   :  { %v1927_v41 = vpop.eup %1926  ;;  %1942 = vlog2.f32 %v3385_v53  ;;  %v1146_v19 = vsub.f32 %v1093_v15, %v869_v37 }
 0x27c   :  { %v1929_v27 = vpop.eup %1928  ;;  %v1051_v20 = vadd.f32 %v1019_v4, %v923_v17  ;;  %v873_v60 = vmul.f32 0.6931472, %v1927_v41  ;;  %v715_v52 = vpop.xlane.xlu1 %714  ;;  %v3390_v4 = vld [vmem:[#allocation67_spill] sm:$0xff] }
 0x27d   :  { %v813_v30 = vpop.xlane.xlu0 %812  ;;  %v1931_v50 = vpop.eup %1930  ;;  %v1429_v0 = vadd.f32 %v1428_v51, %v1146_v19  ;;  %v1095_v59 = vmul.f32 0.6931472, %v1929_v27  ;;  %1944 = vlog2.f32 %v715_v52  ;;  %v926_v63 = vsub.f32 %v2889_v29, %v3390_v4  ;;  %v3391_v27 = vld [vmem:[#allocation97_spill] sm:$0xff] }
 0x27e   :  { %v1389_v28 = vadd.f32 %v1388_v31, %v1051_v20  ;;  %v1020_v34 = vsub.f32 %v873_v60, %v969_v3  ;;  %1946 = vlog2.f32 %v813_v30  ;;  %v971_v26 = vmul.f32 0.6931472, %v1931_v50 }
 0x27f   :  { %v1933_v24 = vpop.eup %1932  ;;  %1948 = vlog2.f32 %v3387_v11  ;;  %v1147_v37 = vsub.f32 %v1095_v59, %v871_v22 }
 0x280   :  { %v1935_v55 = vpop.eup %1934  ;;  %v1052_v6 = vadd.f32 %v1020_v34, %v924_v44  ;;  %v875_v42 = vmul.f32 0.6931472, %v1933_v24  ;;  %v717_v18 = vpop.xlane.xlu1 %716  ;;  %v3392_v34 = vld [vmem:[#allocation68_spill] sm:$0xff] }
 0x281   :  { %v815_v38 = vpop.xlane.xlu0 %814  ;;  %v1937_v2 = vpop.eup %1936  ;;  %v1430_v14 = vadd.f32 %v1429_v0, %v1147_v37  ;;  %v1097_v23 = vmul.f32 0.6931472, %v1935_v55  ;;  %1950 = vlog2.f32 %v717_v18  ;;  %v927_v29 = vsub.f32 %v2894_v25, %v3392_v34  ;;  %v1462_v34 = vld [vmem:[#allocation6] sm:$0x1] }
 0x282   :  { %v1390_v61 = vadd.f32 %v1389_v28, %v1052_v6  ;;  %v1021_v43 = vsub.f32 %v875_v42, %v971_v26  ;;  %1952 = vlog2.f32 %v815_v38  ;;  %v973_v32 = vmul.f32 0.6931472, %v1937_v2  ;;  %v3393_v26 = vld [vmem:[#allocation100_spill] sm:$0xff]  ;;  %v3394_v2 = vld [vmem:[#allocation30_spill] sm:$0xff] }
 0x283   :  { %v1939_v39 = vpop.eup %1938  ;;  %1954 = vlog2.f32 %v3389_v10  ;;  %v1148_v9 = vsub.f32 %v1097_v23, %v873_v60 }
 0x284   :  { %v1941_v22 = vpop.eup %1940  ;;  %v1053_v21 = vadd.f32 %v1021_v43, %v925_v1  ;;  %v877_v36 = vmul.f32 0.6931472, %v1939_v39  ;;  %v719_v51 = vpop.xlane.xlu1 %718 }
 0x285   :  { %v817_v15 = vpop.xlane.xlu0 %816  ;;  %v1943_v58 = vpop.eup %1942  ;;  %v1431_v17 = vadd.f32 %v1430_v14, %v1148_v9  ;;  %v1099_v31 = vmul.f32 0.6931472, %v1941_v22  ;;  %1956 = vlog2.f32 %v719_v51  ;;  %v928_v14 = vsub.f32 %v2899_v5, %v3394_v2  ;;  %v3395_v51 = vld [vmem:[#allocation101_spill] sm:$0xff] }
 0x286   :  { %v1391_v41 = vadd.f32 %v1390_v61, %v1053_v21  ;;  %v1022_v53 = vsub.f32 %v877_v36, %v973_v32  ;;  %1958 = vlog2.f32 %v817_v15  ;;  %v975_v60 = vmul.f32 0.6931472, %v1943_v58 }
 0x287   :  { %v1945_v19 = vpop.eup %1944  ;;  %1960 = vlog2.f32 %v3391_v27  ;;  %v1149_v3 = vsub.f32 %v1099_v31, %v875_v42  ;;  %v3396_v27 = vld [vmem:[#allocation32_spill] sm:$0xff] }
 0x288   :  { %v1947_v20 = vpop.eup %1946  ;;  %v1054_v52 = vadd.f32 %v1022_v53, %v926_v63  ;;  %v879_v30 = vmul.f32 0.6931472, %v1945_v19  ;;  %v721_v50 = vpop.xlane.xlu1 %720 }
 0x289   :  { %v819_v0 = vpop.xlane.xlu0 %818  ;;  %v1949_v59 = vpop.eup %1948  ;;  %v1432_v62 = vadd.f32 %v1431_v17, %v1149_v3  ;;  %v1101_v44 = vmul.f32 0.6931472, %v1947_v20  ;;  %1962 = vlog2.f32 %v721_v50  ;;  %v929_v3 = vsub.f32 %v2904_v33, %v3396_v27 }
 0x28a   :  { %v1583_v28 = vpop.f32.mrb[0].mxu1  ;;  %v1392_v24 = vadd.f32 %v1391_v41, %v1054_v52  ;;  %v1023_v11 = vsub.f32 %v879_v30, %v975_v60  ;;  %1964 = vlog2.f32 %v819_v0  ;;  %v977_v38 = vmul.f32 0.6931472, %v1949_v59 }
 0x28b   :  { %v1584_v37 = vpop.f32.mrb[1].mxu1  ;;  %v1951_v55 = vpop.eup %1950  ;;  %1966 = vlog2.f32 %v3393_v26  ;;  %v1150_v6 = vsub.f32 %v1101_v44, %v877_v36 }
 0x28c   :  { %v1585_v42 = vadd.f32 %v1584_v37, %v1583_v28  ;;  %v1953_v18 = vpop.eup %1952  ;;  %v1055_v23 = vadd.f32 %v1023_v11, %v927_v29  ;;  %v881_v13 = vmul.f32 0.6931472, %v1951_v55  ;;  %v1548_v1 = vpop.f32.mrb[0].mxu0 }
 0x28d   :  { %v723_v61 = vpop.xlane.xlu1 %722  ;;  %v1955_v43 = vpop.eup %1954  ;;  %v1433_v25 = vadd.f32 %v1432_v62, %v1150_v6  ;;  %v1103_v39 = vmul.f32 0.6931472, %v1953_v18 }
 0x28e   :  { %1968 = vlog2.f32 %v723_v61  ;;  %v1549_v10 = vpop.f32.mrb[1].mxu0  ;;  %v821_v9 = vpop.xlane.xlu0 %820  ;;  %v1393_v22 = vadd.f32 %v1392_v24, %v1055_v23  ;;  %v1024_v32 = vsub.f32 %v881_v13, %v977_v38  ;;  %1377 = vst [vmem:[#allocation3] sm:$0xff] %v1585_v42  ;;  %v979_v58 = vmul.f32 0.6931472, %v1955_v43  ;;  %v3398_v24 = vld [vmem:[#allocation34_spill] sm:$0xff]  ;;  %v3399_v38 = vld [vmem:[#allocation104_spill] sm:$0xff] }
 0x28f   :  { %v1550_v21 = vadd.f32 %v1549_v10, %v1548_v1  ;;  %1970 = vlog2.f32 %v821_v9  ;;  %v1957_v36 = vpop.eup %1956  ;;  %v1151_v15 = vsub.f32 %v1103_v39, %v879_v30  ;;  %v3397_v30 = vld [vmem:[#allocation103_spill] sm:$0xff]  ;;  %v930_v11 = vsub.f32 %v2909_v57, %v3398_v24 }
 0x290   :  { %1972 = vlog2.f32 %v3395_v51  ;;  %v1959_v5 = vpop.eup %1958  ;;  %v1056_v17 = vadd.f32 %v1024_v32, %v928_v14  ;;  %v883_v31 = vmul.f32 0.6931472, %v1957_v36  ;;  %v3400_v1 = vld [vmem:[#allocation35_spill] sm:$0xff] }
 0x291   :  { %v725_v4 = vpop.xlane.xlu1 %724  ;;  %v1961_v63 = vpop.eup %1960  ;;  %v1434_v41 = vadd.f32 %v1433_v25, %v1151_v15  ;;  %v1105_v53 = vmul.f32 0.6931472, %v1959_v5  ;;  %1304 = vst [vmem:[#allocation2] sm:$0xff] %v1550_v21  ;;  %v931_v61 = vsub.f32 %v2914_v7, %v3400_v1 }
 0x292   :  { %1974 = vlog2.f32 %v725_v4  ;;  %v823_v19 = vpop.xlane.xlu0 %822  ;;  %v1394_v20 = vadd.f32 %v1393_v22, %v1056_v17  ;;  %v1025_v60 = vsub.f32 %v883_v31, %v979_v58  ;;  %v981_v59 = vmul.f32 0.6931472, %v1961_v63  ;;  %v3401_v58 = vld [vmem:[#allocation105_spill] sm:$0xff] }
 0x293   :  { %1976 = vlog2.f32 %v823_v19  ;;  %v1963_v52 = vpop.eup %1962  ;;  %v1152_v50 = vsub.f32 %v1105_v53, %v881_v13 }
 0x294   :  { %1978 = vlog2.f32 %v3397_v30  ;;  %v1965_v0 = vpop.eup %1964  ;;  %v1057_v62 = vadd.f32 %v1025_v60, %v929_v3  ;;  %v885_v44 = vmul.f32 0.6931472, %v1963_v52 }
 0x295   :  { %v727_v28 = vpop.xlane.xlu1 %726  ;;  %v1967_v29 = vpop.eup %1966  ;;  %v1435_v37 = vadd.f32 %v1434_v41, %v1152_v50  ;;  %v1107_v33 = vmul.f32 0.6931472, %v1965_v0  ;;  %v1470_v42 = vld [vmem:[#allocation3] sm:$0x1]  ;;  %v3403_v0 = vld [vmem:[#allocation106_spill] sm:$0xff] }
 0x296   :  { %1980 = vlog2.f32 %v727_v28  ;;  %v825_v55 = vpop.xlane.xlu0 %824  ;;  %v1395_v26 = vadd.f32 %v1394_v20, %v1057_v62  ;;  %v1026_v6 = vsub.f32 %v885_v44, %v981_v59  ;;  %v1471_v14 = vmul.f32 %v1470_v42, %v1462_v34  ;;  %v3402_v20 = vld [vmem:[#allocation38_spill] sm:$0xff] }
 0x297   :  { %1982 = vlog2.f32 %v825_v55  ;;  %v1153_v2 = vsub.f32 %v1107_v33, %v883_v31  ;;  %v983_v13 = vmul.f32 0.6931472, %v1967_v29  ;;  %v932_v60 = vsub.f32 %v2919_v35, %v3402_v20  ;;  %v3404_v55 = vld [vmem:[#allocation39_spill] sm:$0xff] }
 0x298   :  { %v1969_v18 = vpop.eup %1968  ;;  %1984 = vlog2.f32 %v3399_v38  ;;  %v1058_v57 = vadd.f32 %v1026_v6, %v930_v11  ;;  %v1472_v32 = vsel %vm1464_vm1, %v1471_v14, 0.0  ;;  %v1463_v21 = vld [vmem:[#allocation2] sm:$0x1]  ;;  %v933_v35 = vsub.f32 %v2924_v16, %v3404_v55 }
 0x299   :  { %v1971_v23 = vpop.eup %1970  ;;  %v887_v43 = vmul.f32 0.6931472, %v1969_v18  ;;  %v729_v25 = vpop.xlane.xlu1 %728  ;;  %v1436_v10 = vadd.f32 %v1435_v37, %v1153_v2  ;;  %1473 = vadd.xlane.f32.xlu0 %v1472_v32  ;;  %v1465_v15 = vsel %vm1464_vm1, %v1463_v21, 0.0  ;;  %v3405_v18 = vld [vmem:[#allocation107_spill] sm:$0xff]  ;;  %v3407_v32 = vld [vmem:[#allocation108_spill] sm:$0xff] }
 0x29a   :  { %v1973_v39 = vpop.eup %1972  ;;  %v1109_v9 = vmul.f32 0.6931472, %v1971_v23  ;;  %1986 = vlog2.f32 %v729_v25  ;;  %v827_v22 = vpop.xlane.xlu0 %826  ;;  %v1396_v36 = vadd.f32 %v1395_v26, %v1058_v57  ;;  %1466 = vadd.xlane.f32.xlu1 %v1465_v15 }
 0x29b   :  { %v1027_v51 = vsub.f32 %v887_v43, %v983_v13  ;;  %1988 = vlog2.f32 %v827_v22  ;;  %v985_v31 = vmul.f32 0.6931472, %v1973_v39  ;;  %v3406_v39 = vld [vmem:[#allocation42_spill] sm:$0xff] }
 0x29c   :  { %v1975_v5 = vpop.eup %1974  ;;  %1990 = vlog2.f32 %v3401_v58  ;;  %v1154_v7 = vsub.f32 %v1109_v9, %v885_v44  ;;  %v934_v16 = vsub.f32 %v2929_v45, %v3406_v39 }
 0x29d   :  { %v1977_v17 = vpop.eup %1976  ;;  %v1059_v4 = vadd.f32 %v1027_v51, %v931_v61  ;;  %v889_v63 = vmul.f32 0.6931472, %v1975_v5  ;;  %v731_v41 = vpop.xlane.xlu1 %730 }
 0x29e   :  { %v1979_v53 = vpop.eup %1978  ;;  %v1437_v19 = vadd.f32 %v1436_v10, %v1154_v7  ;;  %v1111_v27 = vmul.f32 0.6931472, %v1977_v17  ;;  %1992 = vlog2.f32 %v731_v41  ;;  %v829_v3 = vpop.xlane.xlu0 %828 }
 0x29f   :  { %v1397_v52 = vadd.f32 %v1396_v36, %v1059_v4  ;;  %v1028_v30 = vsub.f32 %v889_v63, %v985_v31  ;;  %1994 = vlog2.f32 %v829_v3  ;;  %v987_v44 = vmul.f32 0.6931472, %v1979_v53 }
 0x2a0   :  { %v1981_v50 = vpop.eup %1980  ;;  %1996 = vlog2.f32 %v3403_v0  ;;  %v1155_v59 = vsub.f32 %v1111_v27, %v887_v43  ;;  %v3409_v27 = vld [vmem:[#allocation109_spill] sm:$0xff] }
 0x2a1   :  { %v1983_v62 = vpop.eup %1982  ;;  %v1060_v28 = vadd.f32 %v1028_v30, %v932_v60  ;;  %v891_v34 = vmul.f32 0.6931472, %v1981_v50  ;;  %v733_v29 = vpop.xlane.xlu1 %732 }
 0x2a2   :  { %v1985_v24 = vpop.eup %1984  ;;  %v1438_v11 = vadd.f32 %v1437_v19, %v1155_v59  ;;  %v1113_v37 = vmul.f32 0.6931472, %v1983_v62  ;;  %1998 = vlog2.f32 %v733_v29  ;;  %v831_v33 = vpop.xlane.xlu0 %830 }
 0x2a3   :  { %v1398_v26 = vadd.f32 %v1397_v52, %v1060_v28  ;;  %v1029_v6 = vsub.f32 %v891_v34, %v987_v44  ;;  %2000 = vlog2.f32 %v831_v33  ;;  %v989_v14 = vmul.f32 0.6931472, %v1985_v24  ;;  %v3410_v28 = vld [vmem:[#allocation46_spill] sm:$0xff] }
 0x2a4   :  { %v1987_v42 = vpop.eup %1986  ;;  %2002 = vlog2.f32 %v3405_v18  ;;  %v1156_v38 = vsub.f32 %v1113_v37, %v889_v63  ;;  %v3408_v63 = vld [vmem:[#allocation43_spill] sm:$0xff] }
 0x2a5   :  { %v1989_v2 = vpop.eup %1988  ;;  %v1061_v23 = vadd.f32 %v1029_v6, %v933_v35  ;;  %v893_v13 = vmul.f32 0.6931472, %v1987_v42  ;;  %v735_v1 = vpop.xlane.xlu1 %734  ;;  %v935_v45 = vsub.f32 %v2934_v48, %v3408_v63  ;;  %v936_v48 = vsub.f32 %v2939_v8, %v3410_v28 }
 0x2a6   :  { %v1991_v61 = vpop.eup %1990  ;;  %v1439_v57 = vadd.f32 %v1438_v11, %v1156_v38  ;;  %v1115_v43 = vmul.f32 0.6931472, %v1989_v2  ;;  %2004 = vlog2.f32 %v735_v1  ;;  %v833_v25 = vpop.xlane.xlu0 %832  ;;  %v3411_v11 = vld [vmem:[#allocation110_spill] sm:$0xff] }
 0x2a7   :  { %v1399_v10 = vadd.f32 %v1398_v26, %v1061_v23  ;;  %v1030_v9 = vsub.f32 %v893_v13, %v989_v14  ;;  %2006 = vlog2.f32 %v833_v25  ;;  %v991_v51 = vmul.f32 0.6931472, %v1991_v61  ;;  %v3412_v14 = vld [vmem:[#allocation47_spill] sm:$0xff]  ;;  %v3413_v61 = vld [vmem:[#allocation54_spill] sm:$0xff] }
 0x2a8   :  { %v1993_v22 = vpop.eup %1992  ;;  %2008 = vlog2.f32 %v3407_v32  ;;  %v1157_v21 = vsub.f32 %v1115_v43, %v891_v34  ;;  %v937_v8 = vsub.f32 %v2944_v47, %v3412_v14 }
 0x2a9   :  { %v1995_v36 = vpop.eup %1994  ;;  %v1062_v15 = vadd.f32 %v1030_v9, %v934_v16  ;;  %v895_v5 = vmul.f32 0.6931472, %v1993_v22  ;;  %v737_v58 = vpop.xlane.xlu1 %736 }
 0x2aa   :  { %v1997_v7 = vpop.eup %1996  ;;  %v1440_v17 = vadd.f32 %v1439_v57, %v1157_v21  ;;  %v1117_v31 = vmul.f32 0.6931472, %v1995_v36  ;;  %2010 = vlog2.f32 %v737_v58  ;;  %v835_v4 = vpop.xlane.xlu0 %834  ;;  %v3414_v36 = vld [vmem:[#allocation50_spill] sm:$0xff]  ;;  %v3415_v58 = vld [vmem:[#allocation57_spill] sm:$0xff] }
 0x2ab   :  { %v1400_v41 = vadd.f32 %v1399_v10, %v1062_v15  ;;  %v1031_v53 = vsub.f32 %v895_v5, %v991_v51  ;;  %2012 = vlog2.f32 %v835_v4  ;;  %v993_v60 = vmul.f32 0.6931472, %v1997_v7 }
 0x2ac   :  { %v1999_v19 = vpop.eup %1998  ;;  %2014 = vlog2.f32 %v3409_v27  ;;  %v1158_v3 = vsub.f32 %v1117_v31, %v893_v13  ;;  %v938_v47 = vsub.f32 %v2949_v46, %v3414_v36 }
 0x2ad   :  { %v2001_v20 = vpop.eup %2000  ;;  %v1063_v52 = vadd.f32 %v1031_v53, %v935_v45  ;;  %v897_v30 = vmul.f32 0.6931472, %v1999_v19  ;;  %v739_v50 = vpop.xlane.xlu1 %738 }
 0x2ae   :  { %v2003_v0 = vpop.eup %2002  ;;  %v1441_v59 = vadd.f32 %v1440_v17, %v1158_v3  ;;  %v1119_v62 = vmul.f32 0.6931472, %v2001_v20  ;;  %2016 = vlog2.f32 %v739_v50  ;;  %v837_v44 = vpop.xlane.xlu0 %836  ;;  %v3416_v3 = vld [vmem:[#allocation51_spill] sm:$0xff] }
 0x2af   :  { %v1401_v34 = vadd.f32 %v1400_v41, %v1063_v52  ;;  %v1032_v29 = vsub.f32 %v897_v30, %v993_v60  ;;  %2018 = vlog2.f32 %v837_v44  ;;  %v995_v55 = vmul.f32 0.6931472, %v2003_v0 }
 0x2b0   :  { %v2005_v24 = vpop.eup %2004  ;;  %2020 = vlog2.f32 %v3411_v11  ;;  %v1159_v37 = vsub.f32 %v1119_v62, %v895_v5  ;;  %v939_v46 = vsub.f32 %v2954_v12, %v3416_v3  ;;  %v3418_v11 = vld [vmem:[#allocation55_spill] sm:$0xff] }
 0x2b1   :  { %v2007_v33 = vpop.eup %2006  ;;  %v1064_v35 = vadd.f32 %v1032_v29, %v936_v48  ;;  %v899_v26 = vmul.f32 0.6931472, %v2005_v24  ;;  %v741_v6 = vpop.xlane.xlu1 %740  ;;  %v940_v12 = vsub.f32 %v2959_v49, %v3418_v11 }
 0x2b2   :  { %v2009_v42 = vpop.eup %2008  ;;  %v1442_v18 = vadd.f32 %v1441_v59, %v1159_v37  ;;  %v1121_v38 = vmul.f32 0.6931472, %v2007_v33  ;;  %2022 = vlog2.f32 %v741_v6  ;;  %v839_v2 = vpop.xlane.xlu0 %838 }
 0x2b3   :  { %v1402_v23 = vadd.f32 %v1401_v34, %v1064_v35  ;;  %v1033_v13 = vsub.f32 %v899_v26, %v995_v55  ;;  %2024 = vlog2.f32 %v839_v2  ;;  %v997_v25 = vmul.f32 0.6931472, %v2009_v42 }
 0x2b4   :  { %v2011_v1 = vpop.eup %2010  ;;  %2026 = vlog2.f32 %v3413_v61  ;;  %v1160_v57 = vsub.f32 %v1121_v38, %v897_v30  ;;  %v3417_v30 = vld [vmem:[#allocation79_spill] sm:$0xff] }
 0x2b5   :  { %v2013_v43 = vpop.eup %2012  ;;  %v1065_v39 = vadd.f32 %v1033_v13, %v937_v8  ;;  %v901_v16 = vmul.f32 0.6931472, %v2011_v1  ;;  %v743_v10 = vpop.xlane.xlu1 %742 }
 0x2b6   :  { %v2015_v9 = vpop.eup %2014  ;;  %v1443_v22 = vadd.f32 %v1442_v18, %v1160_v57  ;;  %v1123_v32 = vmul.f32 0.6931472, %v2013_v43  ;;  %2028 = vlog2.f32 %v743_v10  ;;  %v841_v21 = vpop.xlane.xlu0 %840 }
 0x2b7   :  { %v1403_v51 = vadd.f32 %v1402_v23, %v1065_v39  ;;  %v1034_v15 = vsub.f32 %v901_v16, %v997_v25  ;;  %2030 = vlog2.f32 %v841_v21  ;;  %v999_v31 = vmul.f32 0.6931472, %v2015_v9  ;;  %v3419_v23 = vld [vmem:[#allocation56_spill] sm:$0xff] }
 0x2b8   :  { %v2017_v5 = vpop.eup %2016  ;;  %2032 = vlog2.f32 %v3415_v58  ;;  %v1161_v7 = vsub.f32 %v1123_v32, %v899_v26  ;;  %v941_v13 = vsub.f32 %v2964_v54, %v3419_v23  ;;  %v3420_v32 = vld [vmem:[#allocation63_spill] sm:$0xff] }
 0x2b9   :  { %v2019_v17 = vpop.eup %2018  ;;  %v1066_v4 = vadd.f32 %v1034_v15, %v938_v47  ;;  %v903_v63 = vmul.f32 0.6931472, %v2017_v5  ;;  %v745_v45 = vpop.xlane.xlu1 %744  ;;  %v942_v21 = vsub.f32 %v2969_v40, %v3420_v32 }
 0x2ba   :  { %v2021_v41 = vpop.eup %2020  ;;  %v1444_v53 = vadd.f32 %v1443_v22, %v1161_v7  ;;  %v1125_v19 = vmul.f32 0.6931472, %v2019_v17  ;;  %2034 = vlog2.f32 %v745_v45  ;;  %v843_v27 = vpop.xlane.xlu0 %842 }
 0x2bb   :  { %v1404_v20 = vadd.f32 %v1403_v51, %v1066_v4  ;;  %v1035_v60 = vsub.f32 %v903_v63, %v999_v31  ;;  %2036 = vlog2.f32 %v843_v27  ;;  %v1001_v59 = vmul.f32 0.6931472, %v2021_v41  ;;  %v3421_v4 = vld [vmem:[#allocation64_spill] sm:$0xff] }
 0x2bc   :  { %v2023_v52 = vpop.eup %2022  ;;  %2038 = vlog2.f32 %v3417_v30  ;;  %v1162_v50 = vsub.f32 %v1125_v19, %v901_v16 }
 0x2bd   :  { %v2025_v0 = vpop.eup %2024  ;;  %v1067_v62 = vadd.f32 %v1035_v60, %v939_v46  ;;  %v905_v44 = vmul.f32 0.6931472, %v2023_v52  ;;  %v747_v28 = vpop.xlane.xlu1 %746 }
 0x2be   :  { %v2027_v48 = vpop.eup %2026  ;;  %v1445_v34 = vadd.f32 %v1444_v53, %v1162_v50  ;;  %v1127_v29 = vmul.f32 0.6931472, %v2025_v0  ;;  %2040 = vlog2.f32 %v747_v28  ;;  %v845_v24 = vpop.xlane.xlu0 %844 }
 0x2bf   :  { %v1405_v37 = vadd.f32 %v1404_v20, %v1067_v62  ;;  %v1036_v33 = vsub.f32 %v905_v44, %v1001_v59  ;;  %2042 = vlog2.f32 %v845_v24  ;;  %v1003_v6 = vmul.f32 0.6931472, %v2027_v48  ;;  %v1419_v24 = vld [vmem:[#allocation5] sm:$0x1] }
 0x2c0   :  { %v2029_v55 = vpop.eup %2028  ;;  %v1163_v35 = vsub.f32 %v1127_v29, %v903_v63  ;;  %v943_v63 = vsub.f32 %v2974_v56, %v3421_v4  ;;  %v1378_v56 = vld [vmem:[#allocation4] sm:$0x1] }
 0x2c1   :  { %v2031_v26 = vpop.eup %2030  ;;  %v1068_v42 = vadd.f32 %v1036_v33, %v940_v12  ;;  %v907_v18 = vmul.f32 0.6931472, %v2029_v55  ;;  %v847_v38 = vpop.xlane.xlu1 %846 }
 0x2c2   :  { %v2033_v2 = vpop.eup %2032  ;;  %v1446_v14 = vadd.f32 %v1445_v34, %v1163_v35  ;;  %v1129_v8 = vmul.f32 0.6931472, %v2031_v26  ;;  %2044 = vlog2.f32 %v847_v38 }
 0x2c3   :  { %v1406_v1 = vadd.f32 %v1405_v37, %v1068_v42  ;;  %v1037_v61 = vsub.f32 %v907_v18, %v1003_v6  ;;  %v1005_v25 = vmul.f32 0.6931472, %v2033_v2  ;;  %v1479_v2 = vlaneseq }
 0x2c4   :  { %v2035_v49 = vpop.eup %2034  ;;  %v1164_v57 = vsub.f32 %v1129_v8, %v905_v44 }
 0x2c5   :  { %v2037_v43 = vpop.eup %2036  ;;  %v1069_v39 = vadd.f32 %v1037_v61, %v941_v13  ;;  %v909_v16 = vmul.f32 0.6931472, %v2035_v49  ;;  %v1482_v8 = vshrl.u32 %v1479_v2, 7 }
 0x2c6   :  { %v2039_v10 = vpop.eup %2038  ;;  %v1447_v9 = vadd.f32 %v1446_v14, %v1164_v57  ;;  %v1131_v22 = vmul.f32 0.6931472, %v2037_v43  ;;  %v1480_v14 = vand.u32 127, %v1479_v2 }
 0x2c7   :  { %v1407_v36 = vadd.f32 %v1406_v1, %v1069_v39  ;;  %v1038_v47 = vsub.f32 %v909_v16, %v1005_v25  ;;  %v1007_v54 = vmul.f32 0.6931472, %v2039_v10  ;;  %vm1483_vm2 = vcmp.eq.s32.totalorder %v1482_v8, 0 }
 0x2c8   :  { %v2041_v51 = vpop.eup %2040  ;;  %v1165_v15 = vsub.f32 %v1131_v22, %v907_v18  ;;  %vm1484_vm3 = vcmp.eq.s32.totalorder %v1480_v14, 0  ;;  %vm1491_vm4 = vcmp.eq.s32.totalorder %v1480_v14, 1 }
 0x2c9   :  { %v2043_v5 = vpop.eup %2042  ;;  %v1070_v58 = vadd.f32 %v1038_v47, %v942_v21  ;;  %v911_v7 = vmul.f32 0.6931472, %v2041_v51  ;;  %vm1485_vm5 = vmand %vm1483_vm2, %vm1484_vm3 }
 0x2ca   :  { %v1448_v17 = vadd.f32 %v1447_v9, %v1165_v15  ;;  %v1133_v31 = vmul.f32 0.6931472, %v2043_v5  ;;  %vm1492_vm6 = vmand %vm1483_vm2, %vm1491_vm4 }
 0x2cb   :  { %v1039_v45 = vsub.f32 %v911_v7, %v1007_v54  ;;  %v1408_v19 = vadd.f32 %v1407_v36, %v1070_v58 }
 0x2cc   :  { %v2045_v41 = vpop.eup %2044  ;;  %v1166_v53 = vsub.f32 %v1133_v31, %v909_v16 }
 0x2cd   :  { %v1071_v27 = vadd.f32 %v1039_v45, %v943_v63  ;;  %v1135_v3 = vmul.f32 0.6931472, %v2045_v41 }
 0x2ce   :  { %v1449_v40 = vadd.f32 %v1448_v17, %v1166_v53 }
 0x2cf   :  { %v1409_v46 = vadd.f32 %v1408_v19, %v1071_v27  ;;  %v1167_v20 = vsub.f32 %v1135_v3, %v911_v7 }
 0x2d1   :  { %v1410_v60 = vrot.slane %v1409_v46, 4  ;;  %v1450_v52 = vadd.f32 %v1449_v40, %v1167_v20 }
 0x2d3   :  { %v1411_v30 = vadd.f32 %v1410_v60, %v1409_v46  ;;  %v1451_v50 = vrot.slane %v1450_v52, 4 }
 0x2d5   :  { %v1412_v0 = vrot.slane %v1411_v30, 2  ;;  %v1452_v59 = vadd.f32 %v1451_v50, %v1450_v52 }
 0x2d7   :  { %v1413_v62 = vadd.f32 %v1412_v0, %v1411_v30  ;;  %v1453_v44 = vrot.slane %v1452_v59, 2 }
 0x2d9   :  { %v1414_v28 = vrot.slane %v1413_v62, 1  ;;  %v1454_v48 = vadd.f32 %v1453_v44, %v1452_v59 }
 0x2db   :  { %v1415_v34 = vadd.f32 %v1414_v28, %v1413_v62  ;;  %v1455_v29 = vrot.slane %v1454_v48, 1 }
 0x2dd   :  { %v1416_v11 = vadd.f32 %v1415_v34, %v1378_v56  ;;  %v1456_v12 = vadd.f32 %v1455_v29, %v1454_v48 }
 0x2df   :  { %1418 = vst.msk [vmem:[#allocation4] sm:$0x1] %vm72_vm0, %v1416_v11  ;;  %v1457_v37 = vadd.f32 %v1456_v12, %v1419_v24 }
 0x2e1   :  { %1458 = vst.msk [vmem:[#allocation5] sm:$0x1] %vm72_vm0, %v1457_v37 }
 0x2e6   :  { %v1468_v35 = vld [vmem:[#allocation4] sm:$0x1] }
 0x2e8   :  { %v1476_v6 = vld [vmem:[#allocation5] sm:$0x1] }
 0x326   :  { %v1474_v33 = vpop.xlane.xlu0 %1473 }
 0x327   :  { %v1475_v55 = vmul.f32 -0.5, %v1474_v33  ;;  %v1467_v26 = vpop.xlane.xlu1 %1466 }
 0x328   :  { %v1469_v42 = vadd.f32 %v1468_v35, %v1467_v26 }
 0x329   :  { %v1477_v18 = vadd.f32 %v1476_v6, %v1475_v55 }
 0x32a   :  { %1650 = vpush %v1469_v42 }
 0x32b   :  { %v1478_v38 = vadd.f32 %v1477_v18, %v1469_v42 }
 0x32d   :  { %1652 = vpush %v1478_v38 }
 0x35b   :  { %s1651_s2 = spop %1650 }
 0x35c   :  { %v1488_v23 = vstv %s1651_s2 }
 0x35d   :  { %v1490_v13 = vsel %vm1485_vm5, %v1488_v23, 0.0 }
 0x35e   :  { %s1653_s23 = spop %1652 }
 0x35f   :  { %v1495_v1 = vstv %s1653_s23 }
 0x360   :  { %v1497_v61 = vsel %vm1492_vm6, %v1495_v1, %v1490_v13 }
 0x361   :  { %1498 = vst [vmem:[#allocation12] sm:$0xff] %v1497_v61 }
 0x362   :  { %2123 = shalt.err (!%p2120_p0)
}
 0x363   :  { %s2124_s27 = scalar_lea.hbm %s3101_s3, 128 }
 0x364   :  { %p2125_p1 = scmp.ne.s32.totalorder %s3101_s3, %s2124_s27  ;;  %p2128_p2 = scmp.lt.u32.totalorder %s2124_s27, %s3101_s3 }
 0x366   :  { %p2130_p3 = pnand %p2128_p2, %p2125_p1 }
 0x368   :  { %2133 = shalt.err (!%p2130_p3)
}
 0x369   :  { %1508 = dma.vmem_to_hbm [thread:$0]  %s1506_s22, 128, %s3101_s3, [#allocation8]  }
 0x36a   :  { %2138 = dma.done.wait [#allocation8], 128  }
 0x36b   :  { %2139 = vsyncadd [#allocation8], 4294967168 }
 0x36c   :  { %1512 = vsyncpa [#allocation7], 1 }
 0x36d   :  { %1513 = vsyncpa [#allocation10], 1 }
 0x36e   :  { %1514 = vsyncpa [#allocation8], 1 }

</bundles_post_ra>
